<compile_context>
chip_gen: v7x
topology: tpu7x:2x2x1
jax: 0.10.0
libtpu: 0.0.40
codegen_flags: <defaults>
</compile_context>

<pallas_src>
import jax
import jax.numpy as jnp
from jax import lax
from jax.experimental import pallas as pl
from jax.experimental.pallas import tpu as pltpu


def _round_up(x, m):
    return (x + m - 1) // m * m


def _tpu_info():
    """(vmem_capacity_bytes, num_tensorcores) with conservative fallbacks."""
    vmem = None
    try:
        vmem = int(pltpu.get_tpu_info().vmem_capacity_bytes)
    except Exception:
        vmem = None
    kind = ""
    try:
        kind = jax.devices()[0].device_kind.lower()
    except Exception:
        kind = ""
    is_v7 = ("v7" in kind) or ("7x" in kind)
    if vmem is None:
        if kind and not is_v7:
            vmem = 128 * (1 << 20)          # v5e / v6e physical VMEM per TC
        else:
            vmem = 64 * (1 << 20)           # v7x (or unknown): be conservative
    cores = 2 if is_v7 else 1
    return vmem, cores


def _sigmoid(x):
    # sigmoid(x) == 0.5 * tanh(0.5 * x) + 0.5  -- a single EUP op per call,
    # avoiding the exp + divide chain on the serial recurrence path.
    return 0.5 * jnp.tanh(0.5 * x) + 0.5


def custom_rnn_lstm(input_, w_ih, w_hh, b_ih, b_hh, ranges=None, lengths=None,
                    *, batch_first=False, block_t=16, block_b=None,
                    output_dtype=None):
    """Pallas implementation of CustomRNN(nn.LSTMCell).forward with hx=None.

    input_: (T, B, I) if batch_first=False else (B, T, I)
    w_ih: (4H, I), w_hh: (4H, H), b_ih/b_hh: (4H,)
    Returns (output, (h_n, c_n)) with output of shape (T*B, H).
    `ranges` / `lengths` are accepted (like the reference forward) but unused.
    """
    del ranges, lengths  # unused by the reference forward
    if batch_first:
        input_ = jnp.transpose(input_, (1, 0, 2))
    T, B, I = input_.shape
    H = w_hh.shape[1]
    out_dtype = input_.dtype if output_dtype is None else output_dtype
    f32, bf16 = jnp.float32, jnp.bfloat16

    vmem_cap_bytes, n_cores = _tpu_info()

    # ---------- padded working shapes (lane / sublane alignment) ----------
    Hp = _round_up(H, 128)                     # lane-aligned hidden size

    # Time blocking: prefer a Tb that divides T (no per-step mask); otherwise
    # use the cap and mask the padded steps.
    Tb_cap = max(1, min(block_t, T))
    Tb = Tb_cap
    for d in range(Tb_cap, 0, -1):
        if T % d == 0:
            if d >= max(1, Tb_cap // 2):
                Tb = d
            break
    Tp = _round_up(T, Tb)
    needs_mask = (Tp != T)

    # Batch blocking: only split batch when the chip actually has 2 TensorCores
    # (v7x); on v5e/v6e extra batch blocks just repeat the serial time loop.
    if block_b is None and n_cores >= 2 and B > 8:
        Bp = _round_up(B, 16)
        Bb = Bp // 2                           # nb == 2 -> one block per TC
    else:
        Bp = _round_up(B, 8)
        Bb = Bp if block_b is None else _round_up(min(block_b, Bp), 8)
        while Bp % Bb:                         # Bb must divide Bp
            Bb += 8
    nb, nt = Bp // Bb, Tp // Tb

    # ---- gate-aligned padding: gates ordered [i|f|g|o], each H -> Hp ----
    def pad_gates(w):                          # (4H, ...) -> (4Hp, ...)
        w4 = w.reshape(4, H, *w.shape[1:])
        pad = [(0, 0), (0, Hp - H)] + [(0, 0)] * (w.ndim - 1)
        return jnp.pad(w4, pad).reshape(4 * Hp, *w.shape[1:])

    wih_p = pad_gates(w_ih.astype(f32))                              # (4Hp, I)
    whh_p = jnp.pad(pad_gates(w_hh.astype(f32)),
                    ((0, 0), (0, Hp - H)))                           # (4Hp, Hp)
    bias_p = pad_gates((b_ih + b_hh).astype(f32).reshape(4 * H, 1))[:, 0]

    wih_t = jnp.transpose(wih_p).astype(bf16)                        # (I, 4Hp)  resident
    whh_t = jnp.transpose(whh_p).astype(bf16)                        # (Hp, 4Hp) resident
    bias2d = bias_p.reshape(1, 4 * Hp)                               # (1, 4Hp)  resident

    # Streamed x: pad to (Tp, Bp, I) and cast to bf16 (MXU operand anyway),
    # halving the HBM read relative to f32.
    xp = jnp.pad(input_.astype(f32),
                 ((0, Tp - T), (0, Bp - B), (0, 0))).astype(bf16)

    # ---------- recurrent kernel (fused input projection + LSTM recurrence) ----------
    def kernel(x_ref, wih_ref, whh_ref, bias_ref, out_ref, hn_ref, cn_ref,
               gx_sc, h_sc, hbf_sc, c_sc):
        t_blk = pl.program_id(1)

        @pl.when(t_blk == 0)
        def _():
            # hx is None in the reference -> zero initial hidden & cell state
            # (re-initialized whenever a new batch block starts).
            h_sc[...] = jnp.zeros_like(h_sc)
            hbf_sc[...] = jnp.zeros_like(hbf_sc)
            c_sc[...] = jnp.zeros_like(c_sc)

        # Fused input projection for this (Tb, Bb) block: one large MXU GEMM
        # per grid step, off the serial recurrence path.
        x_blk = x_ref[...].reshape(Tb * Bb, I)
        gx_sc[...] = (jnp.dot(x_blk, wih_ref[...], preferred_element_type=f32)
                      + bias_ref[...]).reshape(Tb, Bb, 4 * Hp)

        def step(tt, carry):
            def do_step():
                # gates = gates_x[t] + h @ W_hh^T   (bf16 MXU operands, f32 accum)
                gates = gx_sc[tt] + jnp.dot(hbf_sc[...], whh_ref[...],
                                            preferred_element_type=f32)  # (Bb, 4Hp)
                i_g = _sigmoid(gates[:, 0 * Hp:1 * Hp])
                f_g = _sigmoid(gates[:, 1 * Hp:2 * Hp])
                g_g = jnp.tanh(gates[:, 2 * Hp:3 * Hp])
                o_g = _sigmoid(gates[:, 3 * Hp:4 * Hp])
                c_new = f_g * c_sc[...] + i_g * g_g                  # f32 state math
                h_new = o_g * jnp.tanh(c_new)
                c_sc[...] = c_new
                h_sc[...] = h_new                                    # f32 (final h_n)
                hbf_sc[...] = h_new.astype(bf16)                     # next MXU operand
                out_ref[tt] = h_new.astype(out_ref.dtype)
            if needs_mask:
                pl.when(t_blk * Tb + tt < T)(do_step)                # skip padded steps
            else:
                do_step()
            return carry

        lax.fori_loop(0, Tb, step, 0, unroll=(True if Tb <= 8 else 8))

        # hn/cn out_specs are constant along the time axis, so their HBM
        # writeback only happens after the last time block of each batch block.
        @pl.when(t_blk == pl.num_programs(1) - 1)
        def _():
            hn_ref[...] = h_sc[...].astype(hn_ref.dtype)
            cn_ref[...] = c_sc[...].astype(cn_ref.dtype)

    # ---------- VMEM budget ----------
    out_bytes = jnp.dtype(out_dtype).itemsize
    vmem_est = (2 * Tb * Bb * I * 2                 # x blocks (bf16, double-buffered)
                + 2 * Tb * Bb * Hp * out_bytes      # output blocks
                + 2 * 2 * Bb * Hp * out_bytes       # hn / cn blocks
                + I * 4 * Hp * 2                    # W_ih^T bf16 (single-buffered)
                + Hp * 4 * Hp * 2                   # W_hh^T bf16 (single-buffered)
                + 4 * Hp * 4                        # bias
                + Tb * Bb * 4 * Hp * 4              # gates_x scratch (f32)
                + Bb * Hp * (4 + 2 + 4))            # h(f32) + h(bf16) + c(f32)
    vmem_cap = int(0.85 * vmem_cap_bytes)
    vmem_limit = int(min(vmem_cap, max(int(1.5 * vmem_est), 32 * (1 << 20))))
    # TODO(synk): if the single-buffered resident weights alone exceed vmem_cap
    # (very large H or I, esp. on v7x's 64 MiB VMEM), additionally tile the 4*Hp
    # output axis of W_ih/W_hh with an extra grid axis.

    const_spec = dict(pipeline_mode=pl.Buffered(1))   # resident, constant index_map

    out_p, hn_p, cn_p = pl.pallas_call(
        kernel,
        out_shape=(jax.ShapeDtypeStruct((Tp, Bp, Hp), out_dtype),
                   jax.ShapeDtypeStruct((Bp, Hp), out_dtype),
                   jax.ShapeDtypeStruct((Bp, Hp), out_dtype)),
        grid_spec=pltpu.PrefetchScalarGridSpec(
            num_scalar_prefetch=0,
            grid=(nb, nt),                                               # (batch, time)
            in_specs=[
                pl.BlockSpec((Tb, Bb, I), lambda b, t: (t, b, 0)),       # x stream
                pl.BlockSpec((I, 4 * Hp), lambda b, t: (0, 0), **const_spec),   # W_ih^T
                pl.BlockSpec((Hp, 4 * Hp), lambda b, t: (0, 0), **const_spec),  # W_hh^T
                pl.BlockSpec((1, 4 * Hp), lambda b, t: (0, 0), **const_spec),   # bias
            ],
            out_specs=[
                pl.BlockSpec((Tb, Bb, Hp), lambda b, t: (t, b, 0)),      # per-step h
                pl.BlockSpec((Bb, Hp), lambda b, t: (b, 0)),             # final h
                pl.BlockSpec((Bb, Hp), lambda b, t: (b, 0)),             # final c
            ],
            scratch_shapes=[pltpu.VMEM((Tb, Bb, 4 * Hp), f32),           # gates_x slab
                            pltpu.VMEM((Bb, Hp), f32),                   # h carry (f32)
                            pltpu.VMEM((Bb, Hp), bf16),                  # h carry (bf16 MXU)
                            pltpu.VMEM((Bb, Hp), f32)],                  # c carry
        ),
        compiler_params=pltpu.CompilerParams(
            dimension_semantics=("parallel", "arbitrary"),
            vmem_limit_bytes=vmem_limit),
    )(xp, wih_t, whh_t, bias2d)

    # torch.cat([h_t (B,H) for t], dim=0) == reshape of (T,B,H) to (T*B,H)
    output = out_p[:T, :B, :H].reshape(T * B, H)
    return output, (hn_p[:B, :H], cn_p[:B, :H])


def _lstm_reference(x, w_ih, w_hh, b_ih, b_hh):
    """Pure-JAX f32 reference matching nn.LSTMCell semantics."""
    T, B, _ = x.shape
    H = w_hh.shape[1]
    h = jnp.zeros((B, H), jnp.float32)
    c = jnp.zeros((B, H), jnp.float32)
    outs = []
    for t in range(T):
        gates = x[t] @ w_ih.T + h @ w_hh.T + b_ih + b_hh
        i = jax.nn.sigmoid(gates[:, :H])
        f = jax.nn.sigmoid(gates[:, H:2 * H])
        g = jnp.tanh(gates[:, 2 * H:3 * H])
        o = jax.nn.sigmoid(gates[:, 3 * H:])
        c = f * c + i * g
        h = o * jnp.tanh(c)
        outs.append(h)
    return jnp.concatenate(outs, 0), (h, c)


if __name__ == "__main__":
    # Small deterministic setup: T=8, B=4, input_size=16, hidden_size=32.
    T, B, I, H = 8, 4, 16, 32
    key = jax.random.PRNGKey(0)
    kx, k1, k2, k3, k4 = jax.random.split(key, 5)

    x = jax.random.normal(kx, (T, B, I), dtype=jnp.float32)

    # nn.LSTMCell.reset_parameters(): uniform(-1/sqrt(H), 1/sqrt(H))
    bound = 1.0 / jnp.sqrt(jnp.float32(H))
    w_ih = jax.random.uniform(k1, (4 * H, I), jnp.float32, -bound, bound)
    w_hh = jax.random.uniform(k2, (4 * H, H), jnp.float32, -bound, bound)
    b_ih = jax.random.uniform(k3, (4 * H,), jnp.float32, -bound, bound)
    b_hh = jax.random.uniform(k4, (4 * H,), jnp.float32, -bound, bound)

    output, (h_n, c_n) = custom_rnn_lstm(x, w_ih, w_hh, b_ih, b_hh)
    jax.block_until_ready((output, h_n, c_n))

    assert output.shape == (T * B, H)
    assert h_n.shape == (B, H) and c_n.shape == (B, H)

    # Sanity check vs. pure-JAX f32 reference (generous tol: bf16 MXU operands;
    # NOTE: bf16 rounding compounds over T -- re-validate at production T/H).
    ref_out, (ref_h, ref_c) = _lstm_reference(x, w_ih, w_hh, b_ih, b_hh)
    assert jnp.allclose(output, ref_out, atol=5e-2, rtol=5e-2)
    assert jnp.allclose(h_n, ref_h, atol=5e-2, rtol=5e-2)
    assert jnp.allclose(c_n, ref_c, atol=5e-2, rtol=5e-2)

    print("KERNEL_OK")
</pallas_src>

<mosaic_0001>
module attributes {stable_mosaic.version = 11 : i64} {
  func.func @kernel(%arg0: i32, %arg1: i32, %arg2: memref<8x8x16xbf16, #tpu.memory_space<vmem>>, %arg3: memref<16x512xbf16, #tpu.memory_space<vmem>>, %arg4: memref<128x512xbf16, #tpu.memory_space<vmem>>, %arg5: memref<1x512xf32, #tpu.memory_space<vmem>>, %arg6: memref<8x8x128xf32, #tpu.memory_space<vmem>>, %arg7: memref<8x128xf32, #tpu.memory_space<vmem>>, %arg8: memref<8x128xf32, #tpu.memory_space<vmem>>, %arg9: memref<8x8x512xf32, #tpu.memory_space<vmem>>, %arg10: memref<8x128xf32, #tpu.memory_space<vmem>>, %arg11: memref<8x128xbf16, #tpu.memory_space<vmem>>, %arg12: memref<8x128xf32, #tpu.memory_space<vmem>>) attributes {dimension_semantics = [#tpu.dimension_semantics<parallel>, #tpu.dimension_semantics<arbitrary>], iteration_bounds = array<i64: 1, 1>, scalar_prefetch = 0 : i64, scratch_operands = 4 : i64, tpu.core_type = #tpu.core_type<tc>, window_params = [{transform_indices = @transform_0, window_bounds = array<i64: 8, 8, 16>}, {pipeline_mode = #tpu.pipeline_mode<synchronous>, transform_indices = @transform_1, window_bounds = array<i64: 16, 512>}, {pipeline_mode = #tpu.pipeline_mode<synchronous>, transform_indices = @transform_2, window_bounds = array<i64: 128, 512>}, {pipeline_mode = #tpu.pipeline_mode<synchronous>, transform_indices = @transform_3, window_bounds = array<i64: 1, 512>}, {transform_indices = @transform_4, window_bounds = array<i64: 8, 8, 128>}, {transform_indices = @transform_5, window_bounds = array<i64: 8, 128>}, {transform_indices = @transform_6, window_bounds = array<i64: 8, 128>}]} {
    %c0_i32 = arith.constant 0 : i32
    %0 = arith.cmpi eq, %arg1, %c0_i32 : i32
    %1 = arith.extui %0 : i1 to i32
    %c0_i32_0 = arith.constant 0 : i32
    %2 = arith.cmpi ne, %1, %c0_i32_0 : i32
    scf.if %2 {
      %cst_221 = arith.constant 0.000000e+00 : f32
      %391 = vector.broadcast %cst_221 : f32 to vector<8x128xf32>
      %c0_222 = arith.constant 0 : index
      %c0_223 = arith.constant 0 : index
      %392 = vector.load %arg10[%c0_222, %c0_223] : memref<8x128xf32, #tpu.memory_space<vmem>>, vector<8x128xf32>
      tpu.vector_store %arg10[%c0_222, %c0_223], %391 {strides = array<i32>} : memref<8x128xf32, #tpu.memory_space<vmem>>, vector<8x128xf32>,
      %cst_224 = arith.constant 0.000000e+00 : bf16
      %393 = vector.broadcast %cst_224 : bf16 to vector<8x128xbf16>
      %c0_225 = arith.constant 0 : index
      %c0_226 = arith.constant 0 : index
      %394 = vector.load %arg11[%c0_225, %c0_226] : memref<8x128xbf16, #tpu.memory_space<vmem>>, vector<8x128xbf16>
      tpu.vector_store %arg11[%c0_225, %c0_226], %393 {strides = array<i32>} : memref<8x128xbf16, #tpu.memory_space<vmem>>, vector<8x128xbf16>,
      %cst_227 = arith.constant 0.000000e+00 : f32
      %395 = vector.broadcast %cst_227 : f32 to vector<8x128xf32>
      %c0_228 = arith.constant 0 : index
      %c0_229 = arith.constant 0 : index
      %396 = vector.load %arg12[%c0_228, %c0_229] : memref<8x128xf32, #tpu.memory_space<vmem>>, vector<8x128xf32>
      tpu.vector_store %arg12[%c0_228, %c0_229], %395 {strides = array<i32>} : memref<8x128xf32, #tpu.memory_space<vmem>>, vector<8x128xf32>,
    } else {
    }
    %c0 = arith.constant 0 : index
    %c0_1 = arith.constant 0 : index
    %c0_2 = arith.constant 0 : index
    %3 = vector.load %arg2[%c0, %c0_1, %c0_2] : memref<8x8x16xbf16, #tpu.memory_space<vmem>>, vector<8x8x16xbf16>
    %4 = vector.shape_cast %3 : vector<8x8x16xbf16> to vector<64x16xbf16>
    %c0_3 = arith.constant 0 : index
    %c0_4 = arith.constant 0 : index
    %5 = vector.load %arg3[%c0_3, %c0_4] : memref<16x512xbf16, #tpu.memory_space<vmem>>, vector<16x512xbf16>
    %cst = arith.constant dense<0.000000e+00> : vector<64x512xf32>
    %6 = tpu.matmul %4, %5, %cst {dimension_numbers = #tpu.dot_dimension_numbers<[1], [0], [0], [1], [0, 0, 1, 1], [], []>} : vector<64x16xbf16>, vector<16x512xbf16>, vector<64x512xf32> -> vector<64x512xf32>
    %c0_5 = arith.constant 0 : index
    %c0_6 = arith.constant 0 : index
    %7 = vector.load %arg5[%c0_5, %c0_6] : memref<1x512xf32, #tpu.memory_space<vmem>>, vector<1x512xf32>
    %8 = vector.broadcast %7 : vector<1x512xf32> to vector<64x512xf32>
    %9 = arith.addf %6, %8 : vector<64x512xf32>
    %10 = vector.shape_cast %9 : vector<64x512xf32> to vector<8x8x512xf32>
    %c0_7 = arith.constant 0 : index
    %c0_8 = arith.constant 0 : index
    %c0_9 = arith.constant 0 : index
    %11 = vector.load %arg9[%c0_7, %c0_8, %c0_9] : memref<8x8x512xf32, #tpu.memory_space<vmem>>, vector<8x8x512xf32>
    tpu.vector_store %arg9[%c0_7, %c0_8, %c0_9], %10 {strides = array<i32>} : memref<8x8x512xf32, #tpu.memory_space<vmem>>, vector<8x8x512xf32>,
    %c0_i32_10 = arith.constant 0 : i32
    %12 = arith.index_cast %c0_i32_10 : i32 to index
    %c0_11 = arith.constant 0 : index
    %c0_12 = arith.constant 0 : index
    %13 = vector.load %arg9[%12, %c0_11, %c0_12] : memref<8x8x512xf32, #tpu.memory_space<vmem>>, vector<1x8x512xf32>
    %14 = vector.shape_cast %13 : vector<1x8x512xf32> to vector<8x512xf32>
    %c0_13 = arith.constant 0 : index
    %c0_14 = arith.constant 0 : index
    %15 = vector.load %arg11[%c0_13, %c0_14] : memref<8x128xbf16, #tpu.memory_space<vmem>>, vector<8x128xbf16>
    %c0_15 = arith.constant 0 : index
    %c0_16 = arith.constant 0 : index
    %16 = vector.load %arg4[%c0_15, %c0_16] : memref<128x512xbf16, #tpu.memory_space<vmem>>, vector<128x512xbf16>
    %cst_17 = arith.constant dense<0.000000e+00> : vector<8x512xf32>
    %17 = tpu.matmul %15, %16, %cst_17 {dimension_numbers = #tpu.dot_dimension_numbers<[1], [0], [0], [1], [0, 0, 1, 1], [], []>} : vector<8x128xbf16>, vector<128x512xbf16>, vector<8x512xf32> -> vector<8x512xf32>
    %18 = arith.addf %14, %17 : vector<8x512xf32>
    %19 = vector.extract_strided_slice %18 {offsets = [0, 0], sizes = [8, 128], strides = [1, 1]} : vector<8x512xf32> to vector<8x128xf32>
    %cst_18 = arith.constant 5.000000e-01 : f32
    %20 = vector.broadcast %cst_18 : f32 to vector<8x128xf32>
    %21 = arith.mulf %20, %19 : vector<8x128xf32>
    %22 = math.tanh %21 : vector<8x128xf32>
    %cst_19 = arith.constant 5.000000e-01 : f32
    %23 = vector.broadcast %cst_19 : f32 to vector<8x128xf32>
    %24 = arith.mulf %23, %22 : vector<8x128xf32>
    %cst_20 = arith.constant 5.000000e-01 : f32
    %25 = vector.broadcast %cst_20 : f32 to vector<8x128xf32>
    %26 = arith.addf %24, %25 : vector<8x128xf32>
    %27 = vector.extract_strided_slice %18 {offsets = [0, 128], sizes = [8, 128], strides = [1, 1]} : vector<8x512xf32> to vector<8x128xf32>
    %cst_21 = arith.constant 5.000000e-01 : f32
    %28 = vector.broadcast %cst_21 : f32 to vector<8x128xf32>
    %29 = arith.mulf %28, %27 : vector<8x128xf32>
    %30 = math.tanh %29 : vector<8x128xf32>
    %cst_22 = arith.constant 5.000000e-01 : f32
    %31 = vector.broadcast %cst_22 : f32 to vector<8x128xf32>
    %32 = arith.mulf %31, %30 : vector<8x128xf32>
    %cst_23 = arith.constant 5.000000e-01 : f32
    %33 = vector.broadcast %cst_23 : f32 to vector<8x128xf32>
    %34 = arith.addf %32, %33 : vector<8x128xf32>
    %35 = vector.extract_strided_slice %18 {offsets = [0, 256], sizes = [8, 128], strides = [1, 1]} : vector<8x512xf32> to vector<8x128xf32>
    %36 = math.tanh %35 : vector<8x128xf32>
    %37 = vector.extract_strided_slice %18 {offsets = [0, 384], sizes = [8, 128], strides = [1, 1]} : vector<8x512xf32> to vector<8x128xf32>
    %cst_24 = arith.constant 5.000000e-01 : f32
    %38 = vector.broadcast %cst_24 : f32 to vector<8x128xf32>
    %39 = arith.mulf %38, %37 : vector<8x128xf32>
    %40 = math.tanh %39 : vector<8x128xf32>
    %cst_25 = arith.constant 5.000000e-01 : f32
    %41 = vector.broadcast %cst_25 : f32 to vector<8x128xf32>
    %42 = arith.mulf %41, %40 : vector<8x128xf32>
    %cst_26 = arith.constant 5.000000e-01 : f32
    %43 = vector.broadcast %cst_26 : f32 to vector<8x128xf32>
    %44 = arith.addf %42, %43 : vector<8x128xf32>
    %c0_27 = arith.constant 0 : index
    %c0_28 = arith.constant 0 : index
    %45 = vector.load %arg12[%c0_27, %c0_28] : memref<8x128xf32, #tpu.memory_space<vmem>>, vector<8x128xf32>
    %46 = arith.mulf %34, %45 : vector<8x128xf32>
    %47 = arith.mulf %26, %36 : vector<8x128xf32>
    %48 = arith.addf %46, %47 : vector<8x128xf32>
    %49 = math.tanh %48 : vector<8x128xf32>
    %50 = arith.mulf %44, %49 : vector<8x128xf32>
    %c0_29 = arith.constant 0 : index
    %c0_30 = arith.constant 0 : index
    %51 = vector.load %arg12[%c0_29, %c0_30] : memref<8x128xf32, #tpu.memory_space<vmem>>, vector<8x128xf32>
    tpu.vector_store %arg12[%c0_29, %c0_30], %48 {strides = array<i32>} : memref<8x128xf32, #tpu.memory_space<vmem>>, vector<8x128xf32>,
    %c0_31 = arith.constant 0 : index
    %c0_32 = arith.constant 0 : index
    %52 = vector.load %arg10[%c0_31, %c0_32] : memref<8x128xf32, #tpu.memory_space<vmem>>, vector<8x128xf32>
    tpu.vector_store %arg10[%c0_31, %c0_32], %50 {strides = array<i32>} : memref<8x128xf32, #tpu.memory_space<vmem>>, vector<8x128xf32>,
    %53 = arith.truncf %50 : vector<8x128xf32> to vector<8x128xbf16>
    %c0_33 = arith.constant 0 : index
    %c0_34 = arith.constant 0 : index
    %54 = vector.load %arg11[%c0_33, %c0_34] : memref<8x128xbf16, #tpu.memory_space<vmem>>, vector<8x128xbf16>
    tpu.vector_store %arg11[%c0_33, %c0_34], %53 {strides = array<i32>} : memref<8x128xbf16, #tpu.memory_space<vmem>>, vector<8x128xbf16>,
    %55 = arith.index_cast %c0_i32_10 : i32 to index
    %c0_35 = arith.constant 0 : index
    %c0_36 = arith.constant 0 : index
    %56 = vector.load %arg6[%55, %c0_35, %c0_36] : memref<8x8x128xf32, #tpu.memory_space<vmem>>, vector<1x8x128xf32>
    %57 = vector.shape_cast %56 : vector<1x8x128xf32> to vector<8x128xf32>
    %58 = vector.shape_cast %50 : vector<8x128xf32> to vector<1x8x128xf32>
    tpu.vector_store %arg6[%55, %c0_35, %c0_36], %58 {strides = array<i32>} : memref<8x8x128xf32, #tpu.memory_space<vmem>>, vector<1x8x128xf32>,
    %c1_i32 = arith.constant 1 : i32
    %59 = arith.index_cast %c1_i32 : i32 to index
    %c0_37 = arith.constant 0 : index
    %c0_38 = arith.constant 0 : index
    %60 = vector.load %arg9[%59, %c0_37, %c0_38] : memref<8x8x512xf32, #tpu.memory_space<vmem>>, vector<1x8x512xf32>
    %61 = vector.shape_cast %60 : vector<1x8x512xf32> to vector<8x512xf32>
    %c0_39 = arith.constant 0 : index
    %c0_40 = arith.constant 0 : index
    %62 = vector.load %arg11[%c0_39, %c0_40] : memref<8x128xbf16, #tpu.memory_space<vmem>>, vector<8x128xbf16>
    %c0_41 = arith.constant 0 : index
    %c0_42 = arith.constant 0 : index
    %63 = vector.load %arg4[%c0_41, %c0_42] : memref<128x512xbf16, #tpu.memory_space<vmem>>, vector<128x512xbf16>
    %cst_43 = arith.constant dense<0.000000e+00> : vector<8x512xf32>
    %64 = tpu.matmul %62, %63, %cst_43 {dimension_numbers = #tpu.dot_dimension_numbers<[1], [0], [0], [1], [0, 0, 1, 1], [], []>} : vector<8x128xbf16>, vector<128x512xbf16>, vector<8x512xf32> -> vector<8x512xf32>
    %65 = arith.addf %61, %64 : vector<8x512xf32>
    %66 = vector.extract_strided_slice %65 {offsets = [0, 0], sizes = [8, 128], strides = [1, 1]} : vector<8x512xf32> to vector<8x128xf32>
    %cst_44 = arith.constant 5.000000e-01 : f32
    %67 = vector.broadcast %cst_44 : f32 to vector<8x128xf32>
    %68 = arith.mulf %67, %66 : vector<8x128xf32>
    %69 = math.tanh %68 : vector<8x128xf32>
    %cst_45 = arith.constant 5.000000e-01 : f32
    %70 = vector.broadcast %cst_45 : f32 to vector<8x128xf32>
    %71 = arith.mulf %70, %69 : vector<8x128xf32>
    %cst_46 = arith.constant 5.000000e-01 : f32
    %72 = vector.broadcast %cst_46 : f32 to vector<8x128xf32>
    %73 = arith.addf %71, %72 : vector<8x128xf32>
    %74 = vector.extract_strided_slice %65 {offsets = [0, 128], sizes = [8, 128], strides = [1, 1]} : vector<8x512xf32> to vector<8x128xf32>
    %cst_47 = arith.constant 5.000000e-01 : f32
    %75 = vector.broadcast %cst_47 : f32 to vector<8x128xf32>
    %76 = arith.mulf %75, %74 : vector<8x128xf32>
    %77 = math.tanh %76 : vector<8x128xf32>
    %cst_48 = arith.constant 5.000000e-01 : f32
    %78 = vector.broadcast %cst_48 : f32 to vector<8x128xf32>
    %79 = arith.mulf %78, %77 : vector<8x128xf32>
    %cst_49 = arith.constant 5.000000e-01 : f32
    %80 = vector.broadcast %cst_49 : f32 to vector<8x128xf32>
    %81 = arith.addf %79, %80 : vector<8x128xf32>
    %82 = vector.extract_strided_slice %65 {offsets = [0, 256], sizes = [8, 128], strides = [1, 1]} : vector<8x512xf32> to vector<8x128xf32>
    %83 = math.tanh %82 : vector<8x128xf32>
    %84 = vector.extract_strided_slice %65 {offsets = [0, 384], sizes = [8, 128], strides = [1, 1]} : vector<8x512xf32> to vector<8x128xf32>
    %cst_50 = arith.constant 5.000000e-01 : f32
    %85 = vector.broadcast %cst_50 : f32 to vector<8x128xf32>
    %86 = arith.mulf %85, %84 : vector<8x128xf32>
    %87 = math.tanh %86 : vector<8x128xf32>
    %cst_51 = arith.constant 5.000000e-01 : f32
    %88 = vector.broadcast %cst_51 : f32 to vector<8x128xf32>
    %89 = arith.mulf %88, %87 : vector<8x128xf32>
    %cst_52 = arith.constant 5.000000e-01 : f32
    %90 = vector.broadcast %cst_52 : f32 to vector<8x128xf32>
    %91 = arith.addf %89, %90 : vector<8x128xf32>
    %c0_53 = arith.constant 0 : index
    %c0_54 = arith.constant 0 : index
    %92 = vector.load %arg12[%c0_53, %c0_54] : memref<8x128xf32, #tpu.memory_space<vmem>>, vector<8x128xf32>
    %93 = arith.mulf %81, %92 : vector<8x128xf32>
    %94 = arith.mulf %73, %83 : vector<8x128xf32>
    %95 = arith.addf %93, %94 : vector<8x128xf32>
    %96 = math.tanh %95 : vector<8x128xf32>
    %97 = arith.mulf %91, %96 : vector<8x128xf32>
    %c0_55 = arith.constant 0 : index
    %c0_56 = arith.constant 0 : index
    %98 = vector.load %arg12[%c0_55, %c0_56] : memref<8x128xf32, #tpu.memory_space<vmem>>, vector<8x128xf32>
    tpu.vector_store %arg12[%c0_55, %c0_56], %95 {strides = array<i32>} : memref<8x128xf32, #tpu.memory_space<vmem>>, vector<8x128xf32>,
    %c0_57 = arith.constant 0 : index
    %c0_58 = arith.constant 0 : index
    %99 = vector.load %arg10[%c0_57, %c0_58] : memref<8x128xf32, #tpu.memory_space<vmem>>, vector<8x128xf32>
    tpu.vector_store %arg10[%c0_57, %c0_58], %97 {strides = array<i32>} : memref<8x128xf32, #tpu.memory_space<vmem>>, vector<8x128xf32>,
    %100 = arith.truncf %97 : vector<8x128xf32> to vector<8x128xbf16>
    %c0_59 = arith.constant 0 : index
    %c0_60 = arith.constant 0 : index
    %101 = vector.load %arg11[%c0_59, %c0_60] : memref<8x128xbf16, #tpu.memory_space<vmem>>, vector<8x128xbf16>
    tpu.vector_store %arg11[%c0_59, %c0_60], %100 {strides = array<i32>} : memref<8x128xbf16, #tpu.memory_space<vmem>>, vector<8x128xbf16>,
    %102 = arith.index_cast %c1_i32 : i32 to index
    %c0_61 = arith.constant 0 : index
    %c0_62 = arith.constant 0 : index
    %103 = vector.load %arg6[%102, %c0_61, %c0_62] : memref<8x8x128xf32, #tpu.memory_space<vmem>>, vector<1x8x128xf32>
    %104 = vector.shape_cast %103 : vector<1x8x128xf32> to vector<8x128xf32>
    %105 = vector.shape_cast %97 : vector<8x128xf32> to vector<1x8x128xf32>
    tpu.vector_store %arg6[%102, %c0_61, %c0_62], %105 {strides = array<i32>} : memref<8x8x128xf32, #tpu.memory_space<vmem>>, vector<1x8x128xf32>,
    %c2_i32 = arith.constant 2 : i32
    %106 = arith.index_cast %c2_i32 : i32 to index
    %c0_63 = arith.constant 0 : index
    %c0_64 = arith.constant 0 : index
    %107 = vector.load %arg9[%106, %c0_63, %c0_64] : memref<8x8x512xf32, #tpu.memory_space<vmem>>, vector<1x8x512xf32>
    %108 = vector.shape_cast %107 : vector<1x8x512xf32> to vector<8x512xf32>
    %c0_65 = arith.constant 0 : index
    %c0_66 = arith.constant 0 : index
    %109 = vector.load %arg11[%c0_65, %c0_66] : memref<8x128xbf16, #tpu.memory_space<vmem>>, vector<8x128xbf16>
    %c0_67 = arith.constant 0 : index
    %c0_68 = arith.constant 0 : index
    %110 = vector.load %arg4[%c0_67, %c0_68] : memref<128x512xbf16, #tpu.memory_space<vmem>>, vector<128x512xbf16>
    %cst_69 = arith.constant dense<0.000000e+00> : vector<8x512xf32>
    %111 = tpu.matmul %109, %110, %cst_69 {dimension_numbers = #tpu.dot_dimension_numbers<[1], [0], [0], [1], [0, 0, 1, 1], [], []>} : vector<8x128xbf16>, vector<128x512xbf16>, vector<8x512xf32> -> vector<8x512xf32>
    %112 = arith.addf %108, %111 : vector<8x512xf32>
    %113 = vector.extract_strided_slice %112 {offsets = [0, 0], sizes = [8, 128], strides = [1, 1]} : vector<8x512xf32> to vector<8x128xf32>
    %cst_70 = arith.constant 5.000000e-01 : f32
    %114 = vector.broadcast %cst_70 : f32 to vector<8x128xf32>
    %115 = arith.mulf %114, %113 : vector<8x128xf32>
    %116 = math.tanh %115 : vector<8x128xf32>
    %cst_71 = arith.constant 5.000000e-01 : f32
    %117 = vector.broadcast %cst_71 : f32 to vector<8x128xf32>
    %118 = arith.mulf %117, %116 : vector<8x128xf32>
    %cst_72 = arith.constant 5.000000e-01 : f32
    %119 = vector.broadcast %cst_72 : f32 to vector<8x128xf32>
    %120 = arith.addf %118, %119 : vector<8x128xf32>
    %121 = vector.extract_strided_slice %112 {offsets = [0, 128], sizes = [8, 128], strides = [1, 1]} : vector<8x512xf32> to vector<8x128xf32>
    %cst_73 = arith.constant 5.000000e-01 : f32
    %122 = vector.broadcast %cst_73 : f32 to vector<8x128xf32>
    %123 = arith.mulf %122, %121 : vector<8x128xf32>
    %124 = math.tanh %123 : vector<8x128xf32>
    %cst_74 = arith.constant 5.000000e-01 : f32
    %125 = vector.broadcast %cst_74 : f32 to vector<8x128xf32>
    %126 = arith.mulf %125, %124 : vector<8x128xf32>
    %cst_75 = arith.constant 5.000000e-01 : f32
    %127 = vector.broadcast %cst_75 : f32 to vector<8x128xf32>
    %128 = arith.addf %126, %127 : vector<8x128xf32>
    %129 = vector.extract_strided_slice %112 {offsets = [0, 256], sizes = [8, 128], strides = [1, 1]} : vector<8x512xf32> to vector<8x128xf32>
    %130 = math.tanh %129 : vector<8x128xf32>
    %131 = vector.extract_strided_slice %112 {offsets = [0, 384], sizes = [8, 128], strides = [1, 1]} : vector<8x512xf32> to vector<8x128xf32>
    %cst_76 = arith.constant 5.000000e-01 : f32
    %132 = vector.broadcast %cst_76 : f32 to vector<8x128xf32>
    %133 = arith.mulf %132, %131 : vector<8x128xf32>
    %134 = math.tanh %133 : vector<8x128xf32>
    %cst_77 = arith.constant 5.000000e-01 : f32
    %135 = vector.broadcast %cst_77 : f32 to vector<8x128xf32>
    %136 = arith.mulf %135, %134 : vector<8x128xf32>
    %cst_78 = arith.constant 5.000000e-01 : f32
    %137 = vector.broadcast %cst_78 : f32 to vector<8x128xf32>
    %138 = arith.addf %136, %137 : vector<8x128xf32>
    %c0_79 = arith.constant 0 : index
    %c0_80 = arith.constant 0 : index
    %139 = vector.load %arg12[%c0_79, %c0_80] : memref<8x128xf32, #tpu.memory_space<vmem>>, vector<8x128xf32>
    %140 = arith.mulf %128, %139 : vector<8x128xf32>
    %141 = arith.mulf %120, %130 : vector<8x128xf32>
    %142 = arith.addf %140, %141 : vector<8x128xf32>
    %143 = math.tanh %142 : vector<8x128xf32>
    %144 = arith.mulf %138, %143 : vector<8x128xf32>
    %c0_81 = arith.constant 0 : index
    %c0_82 = arith.constant 0 : index
    %145 = vector.load %arg12[%c0_81, %c0_82] : memref<8x128xf32, #tpu.memory_space<vmem>>, vector<8x128xf32>
    tpu.vector_store %arg12[%c0_81, %c0_82], %142 {strides = array<i32>} : memref<8x128xf32, #tpu.memory_space<vmem>>, vector<8x128xf32>,
    %c0_83 = arith.constant 0 : index
    %c0_84 = arith.constant 0 : index
    %146 = vector.load %arg10[%c0_83, %c0_84] : memref<8x128xf32, #tpu.memory_space<vmem>>, vector<8x128xf32>
    tpu.vector_store %arg10[%c0_83, %c0_84], %144 {strides = array<i32>} : memref<8x128xf32, #tpu.memory_space<vmem>>, vector<8x128xf32>,
    %147 = arith.truncf %144 : vector<8x128xf32> to vector<8x128xbf16>
    %c0_85 = arith.constant 0 : index
    %c0_86 = arith.constant 0 : index
    %148 = vector.load %arg11[%c0_85, %c0_86] : memref<8x128xbf16, #tpu.memory_space<vmem>>, vector<8x128xbf16>
    tpu.vector_store %arg11[%c0_85, %c0_86], %147 {strides = array<i32>} : memref<8x128xbf16, #tpu.memory_space<vmem>>, vector<8x128xbf16>,
    %149 = arith.index_cast %c2_i32 : i32 to index
    %c0_87 = arith.constant 0 : index
    %c0_88 = arith.constant 0 : index
    %150 = vector.load %arg6[%149, %c0_87, %c0_88] : memref<8x8x128xf32, #tpu.memory_space<vmem>>, vector<1x8x128xf32>
    %151 = vector.shape_cast %150 : vector<1x8x128xf32> to vector<8x128xf32>
    %152 = vector.shape_cast %144 : vector<8x128xf32> to vector<1x8x128xf32>
    tpu.vector_store %arg6[%149, %c0_87, %c0_88], %152 {strides = array<i32>} : memref<8x8x128xf32, #tpu.memory_space<vmem>>, vector<1x8x128xf32>,
    %c3_i32 = arith.constant 3 : i32
    %153 = arith.index_cast %c3_i32 : i32 to index
    %c0_89 = arith.constant 0 : index
    %c0_90 = arith.constant 0 : index
    %154 = vector.load %arg9[%153, %c0_89, %c0_90] : memref<8x8x512xf32, #tpu.memory_space<vmem>>, vector<1x8x512xf32>
    %155 = vector.shape_cast %154 : vector<1x8x512xf32> to vector<8x512xf32>
    %c0_91 = arith.constant 0 : index
    %c0_92 = arith.constant 0 : index
    %156 = vector.load %arg11[%c0_91, %c0_92] : memref<8x128xbf16, #tpu.memory_space<vmem>>, vector<8x128xbf16>
    %c0_93 = arith.constant 0 : index
    %c0_94 = arith.constant 0 : index
    %157 = vector.load %arg4[%c0_93, %c0_94] : memref<128x512xbf16, #tpu.memory_space<vmem>>, vector<128x512xbf16>
    %cst_95 = arith.constant dense<0.000000e+00> : vector<8x512xf32>
    %158 = tpu.matmul %156, %157, %cst_95 {dimension_numbers = #tpu.dot_dimension_numbers<[1], [0], [0], [1], [0, 0, 1, 1], [], []>} : vector<8x128xbf16>, vector<128x512xbf16>, vector<8x512xf32> -> vector<8x512xf32>
    %159 = arith.addf %155, %158 : vector<8x512xf32>
    %160 = vector.extract_strided_slice %159 {offsets = [0, 0], sizes = [8, 128], strides = [1, 1]} : vector<8x512xf32> to vector<8x128xf32>
    %cst_96 = arith.constant 5.000000e-01 : f32
    %161 = vector.broadcast %cst_96 : f32 to vector<8x128xf32>
    %162 = arith.mulf %161, %160 : vector<8x128xf32>
    %163 = math.tanh %162 : vector<8x128xf32>
    %cst_97 = arith.constant 5.000000e-01 : f32
    %164 = vector.broadcast %cst_97 : f32 to vector<8x128xf32>
    %165 = arith.mulf %164, %163 : vector<8x128xf32>
    %cst_98 = arith.constant 5.000000e-01 : f32
    %166 = vector.broadcast %cst_98 : f32 to vector<8x128xf32>
    %167 = arith.addf %165, %166 : vector<8x128xf32>
    %168 = vector.extract_strided_slice %159 {offsets = [0, 128], sizes = [8, 128], strides = [1, 1]} : vector<8x512xf32> to vector<8x128xf32>
    %cst_99 = arith.constant 5.000000e-01 : f32
    %169 = vector.broadcast %cst_99 : f32 to vector<8x128xf32>
    %170 = arith.mulf %169, %168 : vector<8x128xf32>
    %171 = math.tanh %170 : vector<8x128xf32>
    %cst_100 = arith.constant 5.000000e-01 : f32
    %172 = vector.broadcast %cst_100 : f32 to vector<8x128xf32>
    %173 = arith.mulf %172, %171 : vector<8x128xf32>
    %cst_101 = arith.constant 5.000000e-01 : f32
    %174 = vector.broadcast %cst_101 : f32 to vector<8x128xf32>
    %175 = arith.addf %173, %174 : vector<8x128xf32>
    %176 = vector.extract_strided_slice %159 {offsets = [0, 256], sizes = [8, 128], strides = [1, 1]} : vector<8x512xf32> to vector<8x128xf32>
    %177 = math.tanh %176 : vector<8x128xf32>
    %178 = vector.extract_strided_slice %159 {offsets = [0, 384], sizes = [8, 128], strides = [1, 1]} : vector<8x512xf32> to vector<8x128xf32>
    %cst_102 = arith.constant 5.000000e-01 : f32
    %179 = vector.broadcast %cst_102 : f32 to vector<8x128xf32>
    %180 = arith.mulf %179, %178 : vector<8x128xf32>
    %181 = math.tanh %180 : vector<8x128xf32>
    %cst_103 = arith.constant 5.000000e-01 : f32
    %182 = vector.broadcast %cst_103 : f32 to vector<8x128xf32>
    %183 = arith.mulf %182, %181 : vector<8x128xf32>
    %cst_104 = arith.constant 5.000000e-01 : f32
    %184 = vector.broadcast %cst_104 : f32 to vector<8x128xf32>
    %185 = arith.addf %183, %184 : vector<8x128xf32>
    %c0_105 = arith.constant 0 : index
    %c0_106 = arith.constant 0 : index
    %186 = vector.load %arg12[%c0_105, %c0_106] : memref<8x128xf32, #tpu.memory_space<vmem>>, vector<8x128xf32>
    %187 = arith.mulf %175, %186 : vector<8x128xf32>
    %188 = arith.mulf %167, %177 : vector<8x128xf32>
    %189 = arith.addf %187, %188 : vector<8x128xf32>
    %190 = math.tanh %189 : vector<8x128xf32>
    %191 = arith.mulf %185, %190 : vector<8x128xf32>
    %c0_107 = arith.constant 0 : index
    %c0_108 = arith.constant 0 : index
    %192 = vector.load %arg12[%c0_107, %c0_108] : memref<8x128xf32, #tpu.memory_space<vmem>>, vector<8x128xf32>
    tpu.vector_store %arg12[%c0_107, %c0_108], %189 {strides = array<i32>} : memref<8x128xf32, #tpu.memory_space<vmem>>, vector<8x128xf32>,
    %c0_109 = arith.constant 0 : index
    %c0_110 = arith.constant 0 : index
    %193 = vector.load %arg10[%c0_109, %c0_110] : memref<8x128xf32, #tpu.memory_space<vmem>>, vector<8x128xf32>
    tpu.vector_store %arg10[%c0_109, %c0_110], %191 {strides = array<i32>} : memref<8x128xf32, #tpu.memory_space<vmem>>, vector<8x128xf32>,
    %194 = arith.truncf %191 : vector<8x128xf32> to vector<8x128xbf16>
    %c0_111 = arith.constant 0 : index
    %c0_112 = arith.constant 0 : index
    %195 = vector.load %arg11[%c0_111, %c0_112] : memref<8x128xbf16, #tpu.memory_space<vmem>>, vector<8x128xbf16>
    tpu.vector_store %arg11[%c0_111, %c0_112], %194 {strides = array<i32>} : memref<8x128xbf16, #tpu.memory_space<vmem>>, vector<8x128xbf16>,
    %196 = arith.index_cast %c3_i32 : i32 to index
    %c0_113 = arith.constant 0 : index
    %c0_114 = arith.constant 0 : index
    %197 = vector.load %arg6[%196, %c0_113, %c0_114] : memref<8x8x128xf32, #tpu.memory_space<vmem>>, vector<1x8x128xf32>
    %198 = vector.shape_cast %197 : vector<1x8x128xf32> to vector<8x128xf32>
    %199 = vector.shape_cast %191 : vector<8x128xf32> to vector<1x8x128xf32>
    tpu.vector_store %arg6[%196, %c0_113, %c0_114], %199 {strides = array<i32>} : memref<8x8x128xf32, #tpu.memory_space<vmem>>, vector<1x8x128xf32>,
    %c4_i32 = arith.constant 4 : i32
    %200 = arith.index_cast %c4_i32 : i32 to index
    %c0_115 = arith.constant 0 : index
    %c0_116 = arith.constant 0 : index
    %201 = vector.load %arg9[%200, %c0_115, %c0_116] : memref<8x8x512xf32, #tpu.memory_space<vmem>>, vector<1x8x512xf32>
    %202 = vector.shape_cast %201 : vector<1x8x512xf32> to vector<8x512xf32>
    %c0_117 = arith.constant 0 : index
    %c0_118 = arith.constant 0 : index
    %203 = vector.load %arg11[%c0_117, %c0_118] : memref<8x128xbf16, #tpu.memory_space<vmem>>, vector<8x128xbf16>
    %c0_119 = arith.constant 0 : index
    %c0_120 = arith.constant 0 : index
    %204 = vector.load %arg4[%c0_119, %c0_120] : memref<128x512xbf16, #tpu.memory_space<vmem>>, vector<128x512xbf16>
    %cst_121 = arith.constant dense<0.000000e+00> : vector<8x512xf32>
    %205 = tpu.matmul %203, %204, %cst_121 {dimension_numbers = #tpu.dot_dimension_numbers<[1], [0], [0], [1], [0, 0, 1, 1], [], []>} : vector<8x128xbf16>, vector<128x512xbf16>, vector<8x512xf32> -> vector<8x512xf32>
    %206 = arith.addf %202, %205 : vector<8x512xf32>
    %207 = vector.extract_strided_slice %206 {offsets = [0, 0], sizes = [8, 128], strides = [1, 1]} : vector<8x512xf32> to vector<8x128xf32>
    %cst_122 = arith.constant 5.000000e-01 : f32
    %208 = vector.broadcast %cst_122 : f32 to vector<8x128xf32>
    %209 = arith.mulf %208, %207 : vector<8x128xf32>
    %210 = math.tanh %209 : vector<8x128xf32>
    %cst_123 = arith.constant 5.000000e-01 : f32
    %211 = vector.broadcast %cst_123 : f32 to vector<8x128xf32>
    %212 = arith.mulf %211, %210 : vector<8x128xf32>
    %cst_124 = arith.constant 5.000000e-01 : f32
    %213 = vector.broadcast %cst_124 : f32 to vector<8x128xf32>
    %214 = arith.addf %212, %213 : vector<8x128xf32>
    %215 = vector.extract_strided_slice %206 {offsets = [0, 128], sizes = [8, 128], strides = [1, 1]} : vector<8x512xf32> to vector<8x128xf32>
    %cst_125 = arith.constant 5.000000e-01 : f32
    %216 = vector.broadcast %cst_125 : f32 to vector<8x128xf32>
    %217 = arith.mulf %216, %215 : vector<8x128xf32>
    %218 = math.tanh %217 : vector<8x128xf32>
    %cst_126 = arith.constant 5.000000e-01 : f32
    %219 = vector.broadcast %cst_126 : f32 to vector<8x128xf32>
    %220 = arith.mulf %219, %218 : vector<8x128xf32>
    %cst_127 = arith.constant 5.000000e-01 : f32
    %221 = vector.broadcast %cst_127 : f32 to vector<8x128xf32>
    %222 = arith.addf %220, %221 : vector<8x128xf32>
    %223 = vector.extract_strided_slice %206 {offsets = [0, 256], sizes = [8, 128], strides = [1, 1]} : vector<8x512xf32> to vector<8x128xf32>
    %224 = math.tanh %223 : vector<8x128xf32>
    %225 = vector.extract_strided_slice %206 {offsets = [0, 384], sizes = [8, 128], strides = [1, 1]} : vector<8x512xf32> to vector<8x128xf32>
    %cst_128 = arith.constant 5.000000e-01 : f32
    %226 = vector.broadcast %cst_128 : f32 to vector<8x128xf32>
    %227 = arith.mulf %226, %225 : vector<8x128xf32>
    %228 = math.tanh %227 : vector<8x128xf32>
    %cst_129 = arith.constant 5.000000e-01 : f32
    %229 = vector.broadcast %cst_129 : f32 to vector<8x128xf32>
    %230 = arith.mulf %229, %228 : vector<8x128xf32>
    %cst_130 = arith.constant 5.000000e-01 : f32
    %231 = vector.broadcast %cst_130 : f32 to vector<8x128xf32>
    %232 = arith.addf %230, %231 : vector<8x128xf32>
    %c0_131 = arith.constant 0 : index
    %c0_132 = arith.constant 0 : index
    %233 = vector.load %arg12[%c0_131, %c0_132] : memref<8x128xf32, #tpu.memory_space<vmem>>, vector<8x128xf32>
    %234 = arith.mulf %222, %233 : vector<8x128xf32>
    %235 = arith.mulf %214, %224 : vector<8x128xf32>
    %236 = arith.addf %234, %235 : vector<8x128xf32>
    %237 = math.tanh %236 : vector<8x128xf32>
    %238 = arith.mulf %232, %237 : vector<8x128xf32>
    %c0_133 = arith.constant 0 : index
    %c0_134 = arith.constant 0 : index
    %239 = vector.load %arg12[%c0_133, %c0_134] : memref<8x128xf32, #tpu.memory_space<vmem>>, vector<8x128xf32>
    tpu.vector_store %arg12[%c0_133, %c0_134], %236 {strides = array<i32>} : memref<8x128xf32, #tpu.memory_space<vmem>>, vector<8x128xf32>,
    %c0_135 = arith.constant 0 : index
    %c0_136 = arith.constant 0 : index
    %240 = vector.load %arg10[%c0_135, %c0_136] : memref<8x128xf32, #tpu.memory_space<vmem>>, vector<8x128xf32>
    tpu.vector_store %arg10[%c0_135, %c0_136], %238 {strides = array<i32>} : memref<8x128xf32, #tpu.memory_space<vmem>>, vector<8x128xf32>,
    %241 = arith.truncf %238 : vector<8x128xf32> to vector<8x128xbf16>
    %c0_137 = arith.constant 0 : index
    %c0_138 = arith.constant 0 : index
    %242 = vector.load %arg11[%c0_137, %c0_138] : memref<8x128xbf16, #tpu.memory_space<vmem>>, vector<8x128xbf16>
    tpu.vector_store %arg11[%c0_137, %c0_138], %241 {strides = array<i32>} : memref<8x128xbf16, #tpu.memory_space<vmem>>, vector<8x128xbf16>,
    %243 = arith.index_cast %c4_i32 : i32 to index
    %c0_139 = arith.constant 0 : index
    %c0_140 = arith.constant 0 : index
    %244 = vector.load %arg6[%243, %c0_139, %c0_140] : memref<8x8x128xf32, #tpu.memory_space<vmem>>, vector<1x8x128xf32>
    %245 = vector.shape_cast %244 : vector<1x8x128xf32> to vector<8x128xf32>
    %246 = vector.shape_cast %238 : vector<8x128xf32> to vector<1x8x128xf32>
    tpu.vector_store %arg6[%243, %c0_139, %c0_140], %246 {strides = array<i32>} : memref<8x8x128xf32, #tpu.memory_space<vmem>>, vector<1x8x128xf32>,
    %c5_i32 = arith.constant 5 : i32
    %247 = arith.index_cast %c5_i32 : i32 to index
    %c0_141 = arith.constant 0 : index
    %c0_142 = arith.constant 0 : index
    %248 = vector.load %arg9[%247, %c0_141, %c0_142] : memref<8x8x512xf32, #tpu.memory_space<vmem>>, vector<1x8x512xf32>
    %249 = vector.shape_cast %248 : vector<1x8x512xf32> to vector<8x512xf32>
    %c0_143 = arith.constant 0 : index
    %c0_144 = arith.constant 0 : index
    %250 = vector.load %arg11[%c0_143, %c0_144] : memref<8x128xbf16, #tpu.memory_space<vmem>>, vector<8x128xbf16>
    %c0_145 = arith.constant 0 : index
    %c0_146 = arith.constant 0 : index
    %251 = vector.load %arg4[%c0_145, %c0_146] : memref<128x512xbf16, #tpu.memory_space<vmem>>, vector<128x512xbf16>
    %cst_147 = arith.constant dense<0.000000e+00> : vector<8x512xf32>
    %252 = tpu.matmul %250, %251, %cst_147 {dimension_numbers = #tpu.dot_dimension_numbers<[1], [0], [0], [1], [0, 0, 1, 1], [], []>} : vector<8x128xbf16>, vector<128x512xbf16>, vector<8x512xf32> -> vector<8x512xf32>
    %253 = arith.addf %249, %252 : vector<8x512xf32>
    %254 = vector.extract_strided_slice %253 {offsets = [0, 0], sizes = [8, 128], strides = [1, 1]} : vector<8x512xf32> to vector<8x128xf32>
    %cst_148 = arith.constant 5.000000e-01 : f32
    %255 = vector.broadcast %cst_148 : f32 to vector<8x128xf32>
    %256 = arith.mulf %255, %254 : vector<8x128xf32>
    %257 = math.tanh %256 : vector<8x128xf32>
    %cst_149 = arith.constant 5.000000e-01 : f32
    %258 = vector.broadcast %cst_149 : f32 to vector<8x128xf32>
    %259 = arith.mulf %258, %257 : vector<8x128xf32>
    %cst_150 = arith.constant 5.000000e-01 : f32
    %260 = vector.broadcast %cst_150 : f32 to vector<8x128xf32>
    %261 = arith.addf %259, %260 : vector<8x128xf32>
    %262 = vector.extract_strided_slice %253 {offsets = [0, 128], sizes = [8, 128], strides = [1, 1]} : vector<8x512xf32> to vector<8x128xf32>
    %cst_151 = arith.constant 5.000000e-01 : f32
    %263 = vector.broadcast %cst_151 : f32 to vector<8x128xf32>
    %264 = arith.mulf %263, %262 : vector<8x128xf32>
    %265 = math.tanh %264 : vector<8x128xf32>
    %cst_152 = arith.constant 5.000000e-01 : f32
    %266 = vector.broadcast %cst_152 : f32 to vector<8x128xf32>
    %267 = arith.mulf %266, %265 : vector<8x128xf32>
    %cst_153 = arith.constant 5.000000e-01 : f32
    %268 = vector.broadcast %cst_153 : f32 to vector<8x128xf32>
    %269 = arith.addf %267, %268 : vector<8x128xf32>
    %270 = vector.extract_strided_slice %253 {offsets = [0, 256], sizes = [8, 128], strides = [1, 1]} : vector<8x512xf32> to vector<8x128xf32>
    %271 = math.tanh %270 : vector<8x128xf32>
    %272 = vector.extract_strided_slice %253 {offsets = [0, 384], sizes = [8, 128], strides = [1, 1]} : vector<8x512xf32> to vector<8x128xf32>
    %cst_154 = arith.constant 5.000000e-01 : f32
    %273 = vector.broadcast %cst_154 : f32 to vector<8x128xf32>
    %274 = arith.mulf %273, %272 : vector<8x128xf32>
    %275 = math.tanh %274 : vector<8x128xf32>
    %cst_155 = arith.constant 5.000000e-01 : f32
    %276 = vector.broadcast %cst_155 : f32 to vector<8x128xf32>
    %277 = arith.mulf %276, %275 : vector<8x128xf32>
    %cst_156 = arith.constant 5.000000e-01 : f32
    %278 = vector.broadcast %cst_156 : f32 to vector<8x128xf32>
    %279 = arith.addf %277, %278 : vector<8x128xf32>
    %c0_157 = arith.constant 0 : index
    %c0_158 = arith.constant 0 : index
    %280 = vector.load %arg12[%c0_157, %c0_158] : memref<8x128xf32, #tpu.memory_space<vmem>>, vector<8x128xf32>
    %281 = arith.mulf %269, %280 : vector<8x128xf32>
    %282 = arith.mulf %261, %271 : vector<8x128xf32>
    %283 = arith.addf %281, %282 : vector<8x128xf32>
    %284 = math.tanh %283 : vector<8x128xf32>
    %285 = arith.mulf %279, %284 : vector<8x128xf32>
    %c0_159 = arith.constant 0 : index
    %c0_160 = arith.constant 0 : index
    %286 = vector.load %arg12[%c0_159, %c0_160] : memref<8x128xf32, #tpu.memory_space<vmem>>, vector<8x128xf32>
    tpu.vector_store %arg12[%c0_159, %c0_160], %283 {strides = array<i32>} : memref<8x128xf32, #tpu.memory_space<vmem>>, vector<8x128xf32>,
    %c0_161 = arith.constant 0 : index
    %c0_162 = arith.constant 0 : index
    %287 = vector.load %arg10[%c0_161, %c0_162] : memref<8x128xf32, #tpu.memory_space<vmem>>, vector<8x128xf32>
    tpu.vector_store %arg10[%c0_161, %c0_162], %285 {strides = array<i32>} : memref<8x128xf32, #tpu.memory_space<vmem>>, vector<8x128xf32>,
    %288 = arith.truncf %285 : vector<8x128xf32> to vector<8x128xbf16>
    %c0_163 = arith.constant 0 : index
    %c0_164 = arith.constant 0 : index
    %289 = vector.load %arg11[%c0_163, %c0_164] : memref<8x128xbf16, #tpu.memory_space<vmem>>, vector<8x128xbf16>
    tpu.vector_store %arg11[%c0_163, %c0_164], %288 {strides = array<i32>} : memref<8x128xbf16, #tpu.memory_space<vmem>>, vector<8x128xbf16>,
    %290 = arith.index_cast %c5_i32 : i32 to index
    %c0_165 = arith.constant 0 : index
    %c0_166 = arith.constant 0 : index
    %291 = vector.load %arg6[%290, %c0_165, %c0_166] : memref<8x8x128xf32, #tpu.memory_space<vmem>>, vector<1x8x128xf32>
    %292 = vector.shape_cast %291 : vector<1x8x128xf32> to vector<8x128xf32>
    %293 = vector.shape_cast %285 : vector<8x128xf32> to vector<1x8x128xf32>
    tpu.vector_store %arg6[%290, %c0_165, %c0_166], %293 {strides = array<i32>} : memref<8x8x128xf32, #tpu.memory_space<vmem>>, vector<1x8x128xf32>,
    %c6_i32 = arith.constant 6 : i32
    %294 = arith.index_cast %c6_i32 : i32 to index
    %c0_167 = arith.constant 0 : index
    %c0_168 = arith.constant 0 : index
    %295 = vector.load %arg9[%294, %c0_167, %c0_168] : memref<8x8x512xf32, #tpu.memory_space<vmem>>, vector<1x8x512xf32>
    %296 = vector.shape_cast %295 : vector<1x8x512xf32> to vector<8x512xf32>
    %c0_169 = arith.constant 0 : index
    %c0_170 = arith.constant 0 : index
    %297 = vector.load %arg11[%c0_169, %c0_170] : memref<8x128xbf16, #tpu.memory_space<vmem>>, vector<8x128xbf16>
    %c0_171 = arith.constant 0 : index
    %c0_172 = arith.constant 0 : index
    %298 = vector.load %arg4[%c0_171, %c0_172] : memref<128x512xbf16, #tpu.memory_space<vmem>>, vector<128x512xbf16>
    %cst_173 = arith.constant dense<0.000000e+00> : vector<8x512xf32>
    %299 = tpu.matmul %297, %298, %cst_173 {dimension_numbers = #tpu.dot_dimension_numbers<[1], [0], [0], [1], [0, 0, 1, 1], [], []>} : vector<8x128xbf16>, vector<128x512xbf16>, vector<8x512xf32> -> vector<8x512xf32>
    %300 = arith.addf %296, %299 : vector<8x512xf32>
    %301 = vector.extract_strided_slice %300 {offsets = [0, 0], sizes = [8, 128], strides = [1, 1]} : vector<8x512xf32> to vector<8x128xf32>
    %cst_174 = arith.constant 5.000000e-01 : f32
    %302 = vector.broadcast %cst_174 : f32 to vector<8x128xf32>
    %303 = arith.mulf %302, %301 : vector<8x128xf32>
    %304 = math.tanh %303 : vector<8x128xf32>
    %cst_175 = arith.constant 5.000000e-01 : f32
    %305 = vector.broadcast %cst_175 : f32 to vector<8x128xf32>
    %306 = arith.mulf %305, %304 : vector<8x128xf32>
    %cst_176 = arith.constant 5.000000e-01 : f32
    %307 = vector.broadcast %cst_176 : f32 to vector<8x128xf32>
    %308 = arith.addf %306, %307 : vector<8x128xf32>
    %309 = vector.extract_strided_slice %300 {offsets = [0, 128], sizes = [8, 128], strides = [1, 1]} : vector<8x512xf32> to vector<8x128xf32>
    %cst_177 = arith.constant 5.000000e-01 : f32
    %310 = vector.broadcast %cst_177 : f32 to vector<8x128xf32>
    %311 = arith.mulf %310, %309 : vector<8x128xf32>
    %312 = math.tanh %311 : vector<8x128xf32>
    %cst_178 = arith.constant 5.000000e-01 : f32
    %313 = vector.broadcast %cst_178 : f32 to vector<8x128xf32>
    %314 = arith.mulf %313, %312 : vector<8x128xf32>
    %cst_179 = arith.constant 5.000000e-01 : f32
    %315 = vector.broadcast %cst_179 : f32 to vector<8x128xf32>
    %316 = arith.addf %314, %315 : vector<8x128xf32>
    %317 = vector.extract_strided_slice %300 {offsets = [0, 256], sizes = [8, 128], strides = [1, 1]} : vector<8x512xf32> to vector<8x128xf32>
    %318 = math.tanh %317 : vector<8x128xf32>
    %319 = vector.extract_strided_slice %300 {offsets = [0, 384], sizes = [8, 128], strides = [1, 1]} : vector<8x512xf32> to vector<8x128xf32>
    %cst_180 = arith.constant 5.000000e-01 : f32
    %320 = vector.broadcast %cst_180 : f32 to vector<8x128xf32>
    %321 = arith.mulf %320, %319 : vector<8x128xf32>
    %322 = math.tanh %321 : vector<8x128xf32>
    %cst_181 = arith.constant 5.000000e-01 : f32
    %323 = vector.broadcast %cst_181 : f32 to vector<8x128xf32>
    %324 = arith.mulf %323, %322 : vector<8x128xf32>
    %cst_182 = arith.constant 5.000000e-01 : f32
    %325 = vector.broadcast %cst_182 : f32 to vector<8x128xf32>
    %326 = arith.addf %324, %325 : vector<8x128xf32>
    %c0_183 = arith.constant 0 : index
    %c0_184 = arith.constant 0 : index
    %327 = vector.load %arg12[%c0_183, %c0_184] : memref<8x128xf32, #tpu.memory_space<vmem>>, vector<8x128xf32>
    %328 = arith.mulf %316, %327 : vector<8x128xf32>
    %329 = arith.mulf %308, %318 : vector<8x128xf32>
    %330 = arith.addf %328, %329 : vector<8x128xf32>
    %331 = math.tanh %330 : vector<8x128xf32>
    %332 = arith.mulf %326, %331 : vector<8x128xf32>
    %c0_185 = arith.constant 0 : index
    %c0_186 = arith.constant 0 : index
    %333 = vector.load %arg12[%c0_185, %c0_186] : memref<8x128xf32, #tpu.memory_space<vmem>>, vector<8x128xf32>
    tpu.vector_store %arg12[%c0_185, %c0_186], %330 {strides = array<i32>} : memref<8x128xf32, #tpu.memory_space<vmem>>, vector<8x128xf32>,
    %c0_187 = arith.constant 0 : index
    %c0_188 = arith.constant 0 : index
    %334 = vector.load %arg10[%c0_187, %c0_188] : memref<8x128xf32, #tpu.memory_space<vmem>>, vector<8x128xf32>
    tpu.vector_store %arg10[%c0_187, %c0_188], %332 {strides = array<i32>} : memref<8x128xf32, #tpu.memory_space<vmem>>, vector<8x128xf32>,
    %335 = arith.truncf %332 : vector<8x128xf32> to vector<8x128xbf16>
    %c0_189 = arith.constant 0 : index
    %c0_190 = arith.constant 0 : index
    %336 = vector.load %arg11[%c0_189, %c0_190] : memref<8x128xbf16, #tpu.memory_space<vmem>>, vector<8x128xbf16>
    tpu.vector_store %arg11[%c0_189, %c0_190], %335 {strides = array<i32>} : memref<8x128xbf16, #tpu.memory_space<vmem>>, vector<8x128xbf16>,
    %337 = arith.index_cast %c6_i32 : i32 to index
    %c0_191 = arith.constant 0 : index
    %c0_192 = arith.constant 0 : index
    %338 = vector.load %arg6[%337, %c0_191, %c0_192] : memref<8x8x128xf32, #tpu.memory_space<vmem>>, vector<1x8x128xf32>
    %339 = vector.shape_cast %338 : vector<1x8x128xf32> to vector<8x128xf32>
    %340 = vector.shape_cast %332 : vector<8x128xf32> to vector<1x8x128xf32>
    tpu.vector_store %arg6[%337, %c0_191, %c0_192], %340 {strides = array<i32>} : memref<8x8x128xf32, #tpu.memory_space<vmem>>, vector<1x8x128xf32>,
    %c7_i32 = arith.constant 7 : i32
    %341 = arith.index_cast %c7_i32 : i32 to index
    %c0_193 = arith.constant 0 : index
    %c0_194 = arith.constant 0 : index
    %342 = vector.load %arg9[%341, %c0_193, %c0_194] : memref<8x8x512xf32, #tpu.memory_space<vmem>>, vector<1x8x512xf32>
    %343 = vector.shape_cast %342 : vector<1x8x512xf32> to vector<8x512xf32>
    %c0_195 = arith.constant 0 : index
    %c0_196 = arith.constant 0 : index
    %344 = vector.load %arg11[%c0_195, %c0_196] : memref<8x128xbf16, #tpu.memory_space<vmem>>, vector<8x128xbf16>
    %c0_197 = arith.constant 0 : index
    %c0_198 = arith.constant 0 : index
    %345 = vector.load %arg4[%c0_197, %c0_198] : memref<128x512xbf16, #tpu.memory_space<vmem>>, vector<128x512xbf16>
    %cst_199 = arith.constant dense<0.000000e+00> : vector<8x512xf32>
    %346 = tpu.matmul %344, %345, %cst_199 {dimension_numbers = #tpu.dot_dimension_numbers<[1], [0], [0], [1], [0, 0, 1, 1], [], []>} : vector<8x128xbf16>, vector<128x512xbf16>, vector<8x512xf32> -> vector<8x512xf32>
    %347 = arith.addf %343, %346 : vector<8x512xf32>
    %348 = vector.extract_strided_slice %347 {offsets = [0, 0], sizes = [8, 128], strides = [1, 1]} : vector<8x512xf32> to vector<8x128xf32>
    %cst_200 = arith.constant 5.000000e-01 : f32
    %349 = vector.broadcast %cst_200 : f32 to vector<8x128xf32>
    %350 = arith.mulf %349, %348 : vector<8x128xf32>
    %351 = math.tanh %350 : vector<8x128xf32>
    %cst_201 = arith.constant 5.000000e-01 : f32
    %352 = vector.broadcast %cst_201 : f32 to vector<8x128xf32>
    %353 = arith.mulf %352, %351 : vector<8x128xf32>
    %cst_202 = arith.constant 5.000000e-01 : f32
    %354 = vector.broadcast %cst_202 : f32 to vector<8x128xf32>
    %355 = arith.addf %353, %354 : vector<8x128xf32>
    %356 = vector.extract_strided_slice %347 {offsets = [0, 128], sizes = [8, 128], strides = [1, 1]} : vector<8x512xf32> to vector<8x128xf32>
    %cst_203 = arith.constant 5.000000e-01 : f32
    %357 = vector.broadcast %cst_203 : f32 to vector<8x128xf32>
    %358 = arith.mulf %357, %356 : vector<8x128xf32>
    %359 = math.tanh %358 : vector<8x128xf32>
    %cst_204 = arith.constant 5.000000e-01 : f32
    %360 = vector.broadcast %cst_204 : f32 to vector<8x128xf32>
    %361 = arith.mulf %360, %359 : vector<8x128xf32>
    %cst_205 = arith.constant 5.000000e-01 : f32
    %362 = vector.broadcast %cst_205 : f32 to vector<8x128xf32>
    %363 = arith.addf %361, %362 : vector<8x128xf32>
    %364 = vector.extract_strided_slice %347 {offsets = [0, 256], sizes = [8, 128], strides = [1, 1]} : vector<8x512xf32> to vector<8x128xf32>
    %365 = math.tanh %364 : vector<8x128xf32>
    %366 = vector.extract_strided_slice %347 {offsets = [0, 384], sizes = [8, 128], strides = [1, 1]} : vector<8x512xf32> to vector<8x128xf32>
    %cst_206 = arith.constant 5.000000e-01 : f32
    %367 = vector.broadcast %cst_206 : f32 to vector<8x128xf32>
    %368 = arith.mulf %367, %366 : vector<8x128xf32>
    %369 = math.tanh %368 : vector<8x128xf32>
    %cst_207 = arith.constant 5.000000e-01 : f32
    %370 = vector.broadcast %cst_207 : f32 to vector<8x128xf32>
    %371 = arith.mulf %370, %369 : vector<8x128xf32>
    %cst_208 = arith.constant 5.000000e-01 : f32
    %372 = vector.broadcast %cst_208 : f32 to vector<8x128xf32>
    %373 = arith.addf %371, %372 : vector<8x128xf32>
    %c0_209 = arith.constant 0 : index
    %c0_210 = arith.constant 0 : index
    %374 = vector.load %arg12[%c0_209, %c0_210] : memref<8x128xf32, #tpu.memory_space<vmem>>, vector<8x128xf32>
    %375 = arith.mulf %363, %374 : vector<8x128xf32>
    %376 = arith.mulf %355, %365 : vector<8x128xf32>
    %377 = arith.addf %375, %376 : vector<8x128xf32>
    %378 = math.tanh %377 : vector<8x128xf32>
    %379 = arith.mulf %373, %378 : vector<8x128xf32>
    %c0_211 = arith.constant 0 : index
    %c0_212 = arith.constant 0 : index
    %380 = vector.load %arg12[%c0_211, %c0_212] : memref<8x128xf32, #tpu.memory_space<vmem>>, vector<8x128xf32>
    tpu.vector_store %arg12[%c0_211, %c0_212], %377 {strides = array<i32>} : memref<8x128xf32, #tpu.memory_space<vmem>>, vector<8x128xf32>,
    %c0_213 = arith.constant 0 : index
    %c0_214 = arith.constant 0 : index
    %381 = vector.load %arg10[%c0_213, %c0_214] : memref<8x128xf32, #tpu.memory_space<vmem>>, vector<8x128xf32>
    tpu.vector_store %arg10[%c0_213, %c0_214], %379 {strides = array<i32>} : memref<8x128xf32, #tpu.memory_space<vmem>>, vector<8x128xf32>,
    %382 = arith.truncf %379 : vector<8x128xf32> to vector<8x128xbf16>
    %c0_215 = arith.constant 0 : index
    %c0_216 = arith.constant 0 : index
    %383 = vector.load %arg11[%c0_215, %c0_216] : memref<8x128xbf16, #tpu.memory_space<vmem>>, vector<8x128xbf16>
    tpu.vector_store %arg11[%c0_215, %c0_216], %382 {strides = array<i32>} : memref<8x128xbf16, #tpu.memory_space<vmem>>, vector<8x128xbf16>,
    %384 = arith.index_cast %c7_i32 : i32 to index
    %c0_217 = arith.constant 0 : index
    %c0_218 = arith.constant 0 : index
    %385 = vector.load %arg6[%384, %c0_217, %c0_218] : memref<8x8x128xf32, #tpu.memory_space<vmem>>, vector<1x8x128xf32>
    %386 = vector.shape_cast %385 : vector<1x8x128xf32> to vector<8x128xf32>
    %387 = vector.shape_cast %379 : vector<8x128xf32> to vector<1x8x128xf32>
    tpu.vector_store %arg6[%384, %c0_217, %c0_218], %387 {strides = array<i32>} : memref<8x8x128xf32, #tpu.memory_space<vmem>>, vector<1x8x128xf32>,
    %c8_i32 = arith.constant 8 : i32
    %c0_i32_219 = arith.constant 0 : i32
    %388 = arith.cmpi eq, %arg1, %c0_i32_219 : i32
    %389 = arith.extui %388 : i1 to i32
    %c0_i32_220 = arith.constant 0 : i32
    %390 = arith.cmpi ne, %389, %c0_i32_220 : i32
    scf.if %390 {
      %c0_221 = arith.constant 0 : index
      %c0_222 = arith.constant 0 : index
      %391 = vector.load %arg10[%c0_221, %c0_222] : memref<8x128xf32, #tpu.memory_space<vmem>>, vector<8x128xf32>
      %c0_223 = arith.constant 0 : index
      %c0_224 = arith.constant 0 : index
      %392 = vector.load %arg7[%c0_223, %c0_224] : memref<8x128xf32, #tpu.memory_space<vmem>>, vector<8x128xf32>
      tpu.vector_store %arg7[%c0_223, %c0_224], %391 {strides = array<i32>} : memref<8x128xf32, #tpu.memory_space<vmem>>, vector<8x128xf32>,
      %c0_225 = arith.constant 0 : index
      %c0_226 = arith.constant 0 : index
      %393 = vector.load %arg12[%c0_225, %c0_226] : memref<8x128xf32, #tpu.memory_space<vmem>>, vector<8x128xf32>
      %c0_227 = arith.constant 0 : index
      %c0_228 = arith.constant 0 : index
      %394 = vector.load %arg8[%c0_227, %c0_228] : memref<8x128xf32, #tpu.memory_space<vmem>>, vector<8x128xf32>
      tpu.vector_store %arg8[%c0_227, %c0_228], %393 {strides = array<i32>} : memref<8x128xf32, #tpu.memory_space<vmem>>, vector<8x128xf32>,
    } else {
    }
    return
  }
  func.func @transform_0(%arg0: i32, %arg1: i32) -> (i32, i32, i32) {
    %c0_i32 = arith.constant 0 : i32
    %c0_i32_0 = arith.constant 0 : i32
    return %arg1, %arg0, %c0_i32 : i32, i32, i32
  }
  func.func @transform_1(%arg0: i32, %arg1: i32) -> (i32, i32) {
    %c0_i32 = arith.constant 0 : i32
    %c0_i32_0 = arith.constant 0 : i32
    %c0_i32_1 = arith.constant 0 : i32
    return %c0_i32, %c0_i32_0 : i32, i32
  }
  func.func @transform_2(%arg0: i32, %arg1: i32) -> (i32, i32) {
    %c0_i32 = arith.constant 0 : i32
    %c0_i32_0 = arith.constant 0 : i32
    %c0_i32_1 = arith.constant 0 : i32
    return %c0_i32, %c0_i32_0 : i32, i32
  }
  func.func @transform_3(%arg0: i32, %arg1: i32) -> (i32, i32) {
    %c0_i32 = arith.constant 0 : i32
    %c0_i32_0 = arith.constant 0 : i32
    %c0_i32_1 = arith.constant 0 : i32
    return %c0_i32, %c0_i32_0 : i32, i32
  }
  func.func @transform_4(%arg0: i32, %arg1: i32) -> (i32, i32, i32) {
    %c0_i32 = arith.constant 0 : i32
    %c0_i32_0 = arith.constant 0 : i32
    return %arg1, %arg0, %c0_i32 : i32, i32, i32
  }
  func.func @transform_5(%arg0: i32, %arg1: i32) -> (i32, i32) {
    %c0_i32 = arith.constant 0 : i32
    %c0_i32_0 = arith.constant 0 : i32
    return %arg0, %c0_i32 : i32, i32
  }
  func.func @transform_6(%arg0: i32, %arg1: i32) -> (i32, i32) {
    %c0_i32 = arith.constant 0 : i32
    %c0_i32_0 = arith.constant 0 : i32
    return %arg0, %c0_i32 : i32, i32
  }
}

</mosaic_0001>

<bundles_post_ra>
// kernel: tpu_custom_call.1
= control target key start
LH: loop header
LB: loop body
LE: loop exit
PB: predicated region body
PF: predicated region fallthrough
CT: control target
= control target key end

     0   :  { %12 = vsyncpa [#allocation7], 0  ;;  %s4163_s0 = inlined_call_operand.hbm [shape: bf16[8,8,16], index: 0, kind: input, shape index: {}]   ;;  %s4164_s1 = inlined_call_operand.hbm [shape: bf16[16,512], index: 1, kind: input, shape index: {}]   ;;  %s4165_s2 = inlined_call_operand.hbm [shape: bf16[128,512], index: 2, kind: input, shape index: {}]   ;;  %s4166_s3 = inlined_call_operand.vmem [shape: f32[1,512], index: 3, kind: input, shape index: {}]   ;;  %s4167_s4 = inlined_call_operand.hbm [shape: f32[8,8,128], index: 4, kind: output, shape index: {0}]   ;;  %s4168_s5 = inlined_call_operand.hbm [shape: f32[8,128], index: 5, kind: output, shape index: {1}]   ;;  %s4169_s6 = inlined_call_operand.hbm [shape: f32[8,128], index: 6, kind: output, shape index: {2}]  }
   0x1   :  { %13 = vsyncpa [#allocation10], 0 }
   0x2   :  { %14 = vsyncpa [#allocation8], 0 }
   0x3   :  { %15 = vsyncpa [#allocation14], 0  ;;  %s3469_s21 = smov [#allocation9]   ;;  %s3329_s25 = scalar_lea.hbm %s4164_s1, 512 }
   0x4   :  { %s33_s22 = sshll.u32 %s3469_s21, 4  ;;  %p3330_p0 = scmp.ne.s32.totalorder %s4164_s1, %s3329_s25  ;;  %s34_s22 = int_to_ptr.vmem [resolvable:$true] %s33_s22 }
   0x5   :  { %p3333_p1 = scmp.lt.u32.totalorder %s3329_s25, %s4164_s1 }
   0x7   :  { %p3335_p2 = pnand %p3333_p1, %p3330_p0 }
   0x9   :  { %3338 = shalt.err (!%p3335_p2)
}
   0xa   :  { %s3339_s30 = scalar_lea.vmem %s34_s22, 512  ;;  %p3344_p4 = scmp.lt.s32.totalorder %s34_s22, %s34_s22 }
   0xb   :  { %p3340_p3 = scmp.ne.s32.totalorder %s34_s22, %s3339_s30  ;;  %p3345_p5 = scmp.lt.s32.totalorder %s3339_s30, %s3339_s30 }
   0xd   :  { %p3346_p6 = por %p3345_p5, %p3344_p4 }
   0xf   :  { %p3347_p7 = pnand %p3346_p6, %p3340_p3 }
  0x11   :  { %3350 = shalt.err (!%p3347_p7)
}
  0x12   :  { %s3470_s7 = smov 256   ;;  %s3471_s8 = smov 16  }
  0x13   :  { %39 = dma.hbm_to_vmem [thread:$0]  %s4164_s1, 512, %s34_s22, [#allocation10], %s3470_s7, %s3470_s7, %s3471_s8  }
  0x14   :  { %s3472_s11 = smov [#allocation6]   ;;  %s3351_s15 = scalar_lea.hbm %s4163_s0, 512 }
  0x15   :  { %s21_s12 = sshll.u32 %s3472_s11, 4  ;;  %p3352_p8 = scmp.ne.s32.totalorder %s4163_s0, %s3351_s15  ;;  %s22_s12 = int_to_ptr.vmem [resolvable:$true] %s21_s12 }
  0x16   :  { %p3355_p9 = scmp.lt.u32.totalorder %s3351_s15, %s4163_s0 }
  0x18   :  { %p3357_p10 = pnand %p3355_p9, %p3352_p8 }
  0x1a   :  { %3360 = shalt.err (!%p3357_p10)
}
  0x1b   :  { %s3361_s20 = scalar_lea.vmem %s22_s12, 512  ;;  %p3366_p12 = scmp.lt.s32.totalorder %s22_s12, %s22_s12 }
  0x1c   :  { %p3362_p11 = scmp.ne.s32.totalorder %s22_s12, %s3361_s20  ;;  %p3367_p13 = scmp.lt.s32.totalorder %s3361_s20, %s3361_s20 }
  0x1e   :  { %p3368_p0 = por %p3367_p13, %p3366_p12 }
  0x20   :  { %p3369_p1 = pnand %p3368_p0, %p3362_p11 }
  0x22   :  { %3372 = shalt.err (!%p3369_p1)
}
  0x23   :  { %s3473_s1 = smov 64   ;;  %s3474_s21 = smov 4  }
  0x24   :  { %27 = dma.hbm_to_vmem [thread:$0]  %s4163_s0, 512, %s22_s12, [#allocation7], %s3473_s1, %s3473_s1, %s3474_s21  }
  0x25   :  { %s3475_s24 = smov [#allocation11]   ;;  %s3373_s28 = scalar_lea.hbm %s4165_s2, 4096 }
  0x26   :  { %s45_s25 = sshll.u32 %s3475_s24, 4  ;;  %p3374_p2 = scmp.ne.s32.totalorder %s4165_s2, %s3373_s28  ;;  %s46_s25 = int_to_ptr.vmem [resolvable:$true] %s45_s25 }
  0x27   :  { %p3377_p3 = scmp.lt.u32.totalorder %s3373_s28, %s4165_s2 }
  0x29   :  { %p3379_p4 = pnand %p3377_p3, %p3374_p2 }
  0x2b   :  { %3382 = shalt.err (!%p3379_p4)
}
  0x2c   :  { %s3383_s11 = scalar_lea.vmem %s46_s25, 4096  ;;  %p3388_p6 = scmp.lt.s32.totalorder %s46_s25, %s46_s25 }
  0x2d   :  { %p3384_p5 = scmp.ne.s32.totalorder %s46_s25, %s3383_s11  ;;  %p3389_p7 = scmp.lt.s32.totalorder %s3383_s11, %s3383_s11 }
  0x2f   :  { %p3390_p8 = por %p3389_p7, %p3388_p6 }
  0x31   :  { %p3391_p9 = pnand %p3390_p8, %p3384_p5 }
  0x33   :  { %3394 = shalt.err (!%p3391_p9)
}
  0x34   :  { %51 = dma.hbm_to_vmem [thread:$0]  %s4165_s2, 4096, %s46_s25, [#allocation10], %s3470_s7, %s3470_s7, %s3471_s8  }
  0x35   :  { %3461 = dma.done.wait [#allocation7], 512  }
  0x36   :  { %3462 = vsyncadd [#allocation7], 4294966784 }
  0x37   :  { %3463 = dma.done.wait [#allocation10], 4608  }
  0x38   :  { %3464 = vsyncadd [#allocation10], 4294962688  ;;  %v4170_v0 = vmov 0   ;;  %v3143_v1 = vld [vmem:[#allocation9 + $0x4] ss:$16 sps:$4 sm:$0xff]   ;;  %vm145_vm0 = vcmask 130048   ;;  %v85_v42 = vlaneseq }
  0x39   :  { %190 = vmatprep.mubr.bf16.mxu0 %v4170_v0  ;;  %69 = vst [vmem:[#allocation4] sm:$0xf] %v4170_v0  ;;  %263 = vmatprep.mubr.bf16.mxu1 %v4170_v0  ;;  %v3145_v2 = vld [vmem:[#allocation9 + $0xc] ss:$16 sps:$4 sm:$0xff]   ;;  %v3147_v3 = vld [vmem:[#allocation9] ss:$16 sps:$4 sm:$0xff]  }
  0x3a   :  { %158 = vmatprep.subr.bf16.mxu0 %v3143_v1  ;;  %v3148_v4 = vld [vmem:[#allocation9 + $0x8] ss:$16 sps:$4 sm:$0xff]   ;;  %231 = vmatprep.subr.bf16.mxu1 %v3145_v2  ;;  %v3149_v5 = vld [vmem:[#allocation6] sm:$0xff]   ;;  %v3569_v9 = vld [vmem:[#allocation11 + $0xc] ss:$16 sps:$4 sm:$0xff]   ;;  %v86_v43 = vshrl.u32 %v85_v42, 7 }
  0x3b   :  { %159 = vmatpush1.bf16.msra.mxu0 %v3147_v3  ;;  %232 = vmatpush1.bf16.msra.mxu1 %v3148_v4  ;;  %v3562_v6 = vld [vmem:[#allocation11] ss:$16 sps:$4 sm:$0xff]   ;;  %v3564_v7 = vld [vmem:[#allocation11 + $0x4] ss:$16 sps:$4 sm:$0xff]   ;;  %v3566_v8 = vld [vmem:[#allocation11 + $0x8] ss:$16 sps:$4 sm:$0xff]  }
  0x3c   :  { %533 = vmatprep.subr.bf16.mxu0 %v3564_v7  ;;  %v3573_v10 = vld [vmem:[#allocation11 + $0x24] ss:$16 sps:$4 sm:$0xff]   ;;  %574 = vmatprep.subr.bf16.mxu1 %v3569_v9  ;;  %v3577_v11 = vld [vmem:[#allocation11 + $0x20] ss:$16 sps:$4 sm:$0xff]   ;;  %v3579_v12 = vld [vmem:[#allocation11 + $0x2c] ss:$16 sps:$4 sm:$0xff]  }
  0x3d   :  { %v3583_v13 = vld [vmem:[#allocation11 + $0x28] ss:$16 sps:$4 sm:$0xff]   ;;  %v3588_v15 = vld [vmem:[#allocation11 + $0x44] ss:$16 sps:$4 sm:$0xff]   ;;  %v3591_v16 = vld [vmem:[#allocation11 + $0x40] ss:$16 sps:$4 sm:$0xff]  }
  0x3e   :  { %2866 = vmatmul.mubr.msk.bf16.vlgmr.msra.gmra.mrb[0].mxu0 %vm145_vm0, %v3149_v5  ;;  %2870 = vmatmul.mubr.msk.bf16.vlgmr.msra.gmra.mrb[0].mxu1 %vm145_vm0, %v3149_v5  ;;  %v3162_v14 = vld [vmem:[#allocation6 + $0x8] sm:$0xff]   ;;  %v3599_v19 = vld [vmem:[#allocation11 + $0x64] ss:$16 sps:$4 sm:$0xff]   ;;  %v3607_v21 = vld [vmem:[#allocation11 + $0x60] ss:$16 sps:$4 sm:$0xff]   ;;  %v95_v44 = vsub.s32 2, %v86_v43 }
  0x3f   :  { %534 = vmatpush1.bf16.msra.mxu0 %v3562_v6  ;;  %575 = vmatpush1.bf16.msra.mxu1 %v3566_v8  ;;  %v3593_v17 = vld [vmem:[#allocation11 + $0x4c] ss:$16 sps:$4 sm:$0xff]   ;;  %v3597_v18 = vld [vmem:[#allocation11 + $0x48] ss:$16 sps:$4 sm:$0xff]   ;;  %v3614_v23 = vld [vmem:[#allocation11 + $0x84] ss:$16 sps:$4 sm:$0xff]  }
  0x40   :  { %535 = vmatprep.subr.bf16.mxu0 %v3573_v10  ;;  %576 = vmatprep.subr.bf16.mxu1 %v3579_v12  ;;  %v3604_v20 = vld [vmem:[#allocation11 + $0x6c] ss:$16 sps:$4 sm:$0xff]   ;;  %v3612_v22 = vld [vmem:[#allocation11 + $0x68] ss:$16 sps:$4 sm:$0xff]   ;;  %v3175_v25 = vld [vmem:[#allocation6 + $0x10] sm:$0xff]   ;;  %v99_v45 = vsub.s32 3, %v86_v43 }
  0x41   :  { %200 = vmatprep.mubr.bf16.mxu0 %v4170_v0  ;;  %273 = vmatprep.mubr.bf16.mxu1 %v4170_v0  ;;  %v3618_v24 = vld [vmem:[#allocation11 + $0x8c] ss:$16 sps:$4 sm:$0xff]   ;;  %v3621_v26 = vld [vmem:[#allocation11 + $0x80] ss:$16 sps:$4 sm:$0xff]   ;;  %v3625_v27 = vld [vmem:[#allocation11 + $0x88] ss:$16 sps:$4 sm:$0xff]  }
  0x42   :  { %v3627_v28 = vld [vmem:[#allocation11 + $0xa4] ss:$16 sps:$4 sm:$0xff]   ;;  %v3630_v29 = vld [vmem:[#allocation11 + $0xac] ss:$16 sps:$4 sm:$0xff]   ;;  %v3634_v30 = vld [vmem:[#allocation11 + $0xa0] ss:$16 sps:$4 sm:$0xff]  }
  0x43   :  { %536 = vmatpush1.bf16.msra.mxu0 %v3577_v11  ;;  %577 = vmatpush1.bf16.msra.mxu1 %v3583_v13  ;;  %v3637_v31 = vld [vmem:[#allocation11 + $0xa8] ss:$16 sps:$4 sm:$0xff]   ;;  %v3642_v32 = vld [vmem:[#allocation11 + $0xc4] ss:$16 sps:$4 sm:$0xff]   ;;  %v3646_v34 = vld [vmem:[#allocation11 + $0xcc] ss:$16 sps:$4 sm:$0xff]  }
  0x44   :  { %537 = vmatprep.subr.bf16.mxu0 %v3588_v15  ;;  %578 = vmatprep.subr.bf16.mxu1 %v3593_v17  ;;  %v3188_v33 = vld [vmem:[#allocation6 + $0x18] sm:$0xff]   ;;  %v3648_v35 = vld [vmem:[#allocation11 + $0xc0] ss:$16 sps:$4 sm:$0xff]   ;;  %v3653_v37 = vld [vmem:[#allocation11 + $0xe4] ss:$16 sps:$4 sm:$0xff]   ;;  %v87_v46 = vsub.s32 0, %v86_v43 }
  0x45   :  { %v3650_v36 = vld [vmem:[#allocation11 + $0xc8] ss:$16 sps:$4 sm:$0xff]   ;;  %v3655_v38 = vld [vmem:[#allocation11 + $0xec] ss:$16 sps:$4 sm:$0xff]   ;;  %v3660_v39 = vld [vmem:[#allocation11 + $0xe0] ss:$16 sps:$4 sm:$0xff]  }
  0x46   :  { %2867 = vmatmul.mubr.msk.bf16.gmra.mrb[4].mxu0 %vm145_vm0, %v3162_v14  ;;  %2871 = vmatmul.mubr.msk.bf16.gmra.mrb[4].mxu1 %vm145_vm0, %v3162_v14  ;;  %v3664_v40 = vld [vmem:[#allocation11 + $0xe8] ss:$16 sps:$4 sm:$0xff]   ;;  %v340_v41 = vld [vmem:[#allocation4] sm:$0xf]  ;;  %v91_v48 = vsub.s32 1, %v86_v43  ;;  %s3478_s13 = smov [#allocation12]  }
  0x47   :  { %538 = vmatpush1.bf16.msra.mxu0 %v3591_v16  ;;  %210 = vmatprep.mubr.bf16.mxu0 %v4170_v0  ;;  %v83_v47 = vld [vmem:[%s4166_s3] sm:$0xf]  ;;  %s3477_s3 = smov [#allocation13]   ;;  %s2818_s14 = sshll.u32 %s3478_s13, 4  ;;  %s4113_s14 = int_to_ptr.vmem [resolvable:$true] %s2818_s14 }
  0x48   :  { %579 = vmatpush1.bf16.msra.mxu1 %v3597_v18  ;;  %539 = vmatprep.subr.bf16.mxu0 %v3599_v19  ;;  %v3713_v49 = vrot.slane %v83_v47, %v95_v44  ;;  %v3719_v52 = vrot.slane %v83_v47, %v99_v45  ;;  %v88_v53 = vrot.slane %v83_v47, %v87_v46  ;;  %s2831_s8 = sshll.u32 %s3477_s3, 4  ;;  %s3479_s15 = smov [#allocation15]   ;;  %s2832_s8 = int_to_ptr.vmem [resolvable:$true] %s2831_s8 }
  0x49   :  { %580 = vmatprep.subr.bf16.mxu1 %v3604_v20  ;;  %283 = vmatprep.mubr.bf16.mxu1 %v4170_v0  ;;  %v92_v56 = vrot.slane %v83_v47, %v91_v48  ;;  %s2841_s16 = sshll.u32 %s3479_s15, 4  ;;  %s3395_s17 = scalar_lea.vmem %s2832_s8, 128  ;;  %s4115_s16 = int_to_ptr.vmem [resolvable:$true] %s2841_s16 }
  0x4a   :  { %p3396_p10 = scmp.ne.s32.totalorder %s2832_s8, %s3395_s17  ;;  %p3400_p11 = scmp.lt.s32.totalorder %s2832_s8, %s2832_s8 }
  0x4b   :  { %540 = vmatpush1.bf16.msra.mxu0 %v3607_v21  ;;  %p3401_p12 = scmp.lt.s32.totalorder %s3395_s17, %s3395_s17 }
  0x4c   :  { %581 = vmatpush1.bf16.msra.mxu1 %v3612_v22  ;;  %541 = vmatprep.subr.bf16.mxu0 %v3614_v23 }
  0x4d   :  { %582 = vmatprep.subr.bf16.mxu1 %v3618_v24  ;;  %p3402_p13 = por %p3401_p12, %p3400_p11 }
  0x4e   :  { %2868 = vmatmul.mubr.msk.bf16.gmra.mrb[8].mxu0 %vm145_vm0, %v3175_v25  ;;  %2872 = vmatmul.mubr.msk.bf16.gmra.mrb[8].mxu1 %vm145_vm0, %v3175_v25 }
  0x4f   :  { %542 = vmatpush1.bf16.msra.mxu0 %v3621_v26  ;;  %220 = vmatprep.mubr.bf16.mxu0 %v4170_v0  ;;  %p3403_p0 = pnand %p3402_p13, %p3396_p10 }
  0x50   :  { %583 = vmatpush1.bf16.msra.mxu1 %v3625_v27  ;;  %543 = vmatprep.subr.bf16.mxu0 %v3627_v28 }
  0x51   :  { %584 = vmatprep.subr.bf16.mxu1 %v3630_v29  ;;  %293 = vmatprep.mubr.bf16.mxu1 %v4170_v0 }
  0x53   :  { %544 = vmatpush1.bf16.msra.mxu0 %v3634_v30 }
  0x54   :  { %585 = vmatpush1.bf16.msra.mxu1 %v3637_v31  ;;  %545 = vmatprep.subr.bf16.mxu0 %v3642_v32 }
  0x55   :  { %586 = vmatprep.subr.bf16.mxu1 %v3646_v34 }
  0x56   :  { %2869 = vmatmul.mubr.msk.bf16.gmra.mrb[12].mxu0 %vm145_vm0, %v3188_v33  ;;  %2873 = vmatmul.mubr.msk.bf16.gmra.mrb[12].mxu1 %vm145_vm0, %v3188_v33 }
  0x57   :  { %546 = vmatpush1.bf16.msra.mxu0 %v3648_v35  ;;  %565 = vmatprep.mubr.bf16.mxu0 %v4170_v0 }
  0x58   :  { %587 = vmatpush1.bf16.msra.mxu1 %v3650_v36  ;;  %547 = vmatprep.subr.bf16.mxu0 %v3653_v37 }
  0x59   :  { %588 = vmatprep.subr.bf16.mxu1 %v3655_v38  ;;  %606 = vmatprep.mubr.bf16.mxu1 %v4170_v0 }
  0x5b   :  { %548 = vmatpush1.bf16.msra.mxu0 %v3660_v39 }
  0x5c   :  { %589 = vmatpush1.bf16.msra.mxu1 %v3664_v40  ;;  %841 = vmatprep.subr.bf16.mxu0 %v3564_v7 }
  0x5d   :  { %882 = vmatprep.subr.bf16.mxu1 %v3569_v9 }
  0x5e   :  { %566 = vmatmul.mubr.bf16.vlgmr.msra.gmra.mrb[16].mxu0 %v340_v41 }
  0x5f   :  { %607 = vmatmul.mubr.bf16.vlgmr.msra.gmra.mrb[16].mxu1 %v340_v41  ;;  %842 = vmatpush1.bf16.msra.mxu0 %v3562_v6 }
  0x60   :  { %883 = vmatpush1.bf16.msra.mxu1 %v3566_v8  ;;  %843 = vmatprep.subr.bf16.mxu0 %v3573_v10 }
  0x61   :  { %884 = vmatprep.subr.bf16.mxu1 %v3579_v12  ;;  %873 = vmatprep.mubr.bf16.mxu0 %v4170_v0 }
  0x62   :  { %914 = vmatprep.mubr.bf16.mxu1 %v4170_v0 }
  0x63   :  { %844 = vmatpush1.bf16.msra.mxu0 %v3577_v11 }
  0x64   :  { %885 = vmatpush1.bf16.msra.mxu1 %v3583_v13  ;;  %845 = vmatprep.subr.bf16.mxu0 %v3588_v15 }
  0x65   :  { %886 = vmatprep.subr.bf16.mxu1 %v3593_v17 }
  0x67   :  { %846 = vmatpush1.bf16.msra.mxu0 %v3591_v16 }
  0x68   :  { %887 = vmatpush1.bf16.msra.mxu1 %v3597_v18  ;;  %847 = vmatprep.subr.bf16.mxu0 %v3599_v19 }
  0x69   :  { %888 = vmatprep.subr.bf16.mxu1 %v3604_v20 }
  0x6b   :  { %848 = vmatpush1.bf16.msra.mxu0 %v3607_v21 }
  0x6c   :  { %889 = vmatpush1.bf16.msra.mxu1 %v3612_v22  ;;  %849 = vmatprep.subr.bf16.mxu0 %v3614_v23 }
  0x6d   :  { %890 = vmatprep.subr.bf16.mxu1 %v3618_v24 }
  0x6f   :  { %850 = vmatpush1.bf16.msra.mxu0 %v3621_v26 }
  0x70   :  { %891 = vmatpush1.bf16.msra.mxu1 %v3625_v27  ;;  %851 = vmatprep.subr.bf16.mxu0 %v3627_v28 }
  0x71   :  { %892 = vmatprep.subr.bf16.mxu1 %v3630_v29 }
  0x73   :  { %852 = vmatpush1.bf16.msra.mxu0 %v3634_v30 }
  0x74   :  { %893 = vmatpush1.bf16.msra.mxu1 %v3637_v31  ;;  %853 = vmatprep.subr.bf16.mxu0 %v3642_v32 }
  0x75   :  { %894 = vmatprep.subr.bf16.mxu1 %v3646_v34 }
  0x77   :  { %854 = vmatpush1.bf16.msra.mxu0 %v3648_v35 }
  0x78   :  { %895 = vmatpush1.bf16.msra.mxu1 %v3650_v36  ;;  %855 = vmatprep.subr.bf16.mxu0 %v3653_v37 }
  0x79   :  { %896 = vmatprep.subr.bf16.mxu1 %v3655_v38 }
  0x7b   :  { %856 = vmatpush1.bf16.msra.mxu0 %v3660_v39 }
  0x7c   :  { %897 = vmatpush1.bf16.msra.mxu1 %v3664_v40  ;;  %1150 = vmatprep.subr.bf16.mxu0 %v3564_v7 }
  0x7d   :  { %1191 = vmatprep.subr.bf16.mxu1 %v3569_v9 }
 0x111   :  { %v3715_v50 = vpop.f32.mrb[0].mxu0  ;;  %v3717_v51 = vpop.f32.mrb[0].mxu1 }
 0x112   :  { %v194_v54 = vpop.f32.mrb[1].mxu0  ;;  %v267_v55 = vpop.f32.mrb[1].mxu1 }
 0x113   :  { %v196_v57 = vpop.f32.mrb[2].mxu0  ;;  %v269_v58 = vpop.f32.mrb[2].mxu1 }
 0x114   :  { %v3721_v59 = vadd.f32 %v196_v57, %v88_v53  ;;  %v198_v60 = vpop.f32.mrb[3].mxu0  ;;  %v3724_v61 = vadd.f32 %v269_v58, %v3713_v49  ;;  %v271_v62 = vpop.f32.mrb[3].mxu1 }
 0x115   :  { %v3726_v63 = vadd.f32 %v198_v60, %v92_v56  ;;  %v3729_v1 = vadd.f32 %v271_v62, %v3719_v52 }
 0x119   :  { %v202_v2 = vpop.f32.mrb[4].mxu0  ;;  %v275_v3 = vpop.f32.mrb[4].mxu1 }
 0x11a   :  { %v3731_v4 = vadd.f32 %v202_v2, %v88_v53  ;;  %v204_v5 = vpop.f32.mrb[5].mxu0  ;;  %v3734_v14 = vadd.f32 %v275_v3, %v3713_v49  ;;  %v277_v25 = vpop.f32.mrb[5].mxu1 }
 0x11b   :  { %v3736_v33 = vadd.f32 %v204_v5, %v92_v56  ;;  %v206_v41 = vpop.f32.mrb[6].mxu0  ;;  %v3739_v42 = vadd.f32 %v277_v25, %v3719_v52  ;;  %v279_v43 = vpop.f32.mrb[6].mxu1 }
 0x11c   :  { %v3741_v44 = vadd.f32 %v206_v41, %v88_v53  ;;  %v208_v45 = vpop.f32.mrb[7].mxu0  ;;  %v3744_v46 = vadd.f32 %v279_v43, %v3713_v49  ;;  %v281_v47 = vpop.f32.mrb[7].mxu1 }
 0x11d   :  { %4172 = vst [vmem:[#allocation20_spill] sm:$0xff] %v3739_v42  ;;  %v3746_v48 = vadd.f32 %v208_v45, %v92_v56  ;;  %v3749_v57 = vadd.f32 %v281_v47, %v3719_v52 }
 0x11e   :  { %4173 = vst [vmem:[#allocation21_spill] sm:$0xff] %v3741_v44  ;;  %4174 = vst [vmem:[#allocation22_spill] sm:$0xff] %v3744_v46 }
 0x11f   :  { %4175 = vst [vmem:[#allocation23_spill] sm:$0xff] %v3746_v48  ;;  %4176 = vst [vmem:[#allocation24_spill] sm:$0xff] %v3749_v57 }
 0x121   :  { %v212_v58 = vpop.f32.mrb[8].mxu0  ;;  %v285_v60 = vpop.f32.mrb[8].mxu1 }
 0x122   :  { %v3751_v62 = vadd.f32 %v212_v58, %v88_v53  ;;  %v214_v2 = vpop.f32.mrb[9].mxu0  ;;  %v3754_v3 = vadd.f32 %v285_v60, %v3713_v49  ;;  %v287_v5 = vpop.f32.mrb[9].mxu1 }
 0x123   :  { %v3756_v25 = vadd.f32 %v214_v2, %v92_v56  ;;  %v216_v41 = vpop.f32.mrb[10].mxu0  ;;  %v3759_v43 = vadd.f32 %v287_v5, %v3719_v52  ;;  %v289_v45 = vpop.f32.mrb[10].mxu1 }
 0x124   :  { %4177 = vst [vmem:[#allocation25_spill] sm:$0xff] %v3751_v62  ;;  %4178 = vst [vmem:[#allocation26_spill] sm:$0xff] %v3754_v3  ;;  %v3761_v0 = vadd.f32 %v216_v41, %v88_v53  ;;  %v218_v47 = vpop.f32.mrb[11].mxu0  ;;  %v3764_v57 = vadd.f32 %v289_v45, %v3713_v49  ;;  %v291_v58 = vpop.f32.mrb[11].mxu1 }
 0x125   :  { %4179 = vst [vmem:[#allocation27_spill] sm:$0xff] %v3756_v25  ;;  %4180 = vst [vmem:[#allocation28_spill] sm:$0xff] %v3759_v43  ;;  %v3766_v62 = vadd.f32 %v218_v47, %v92_v56  ;;  %v3769_v60 = vadd.f32 %v291_v58, %v3719_v52 }
 0x126   :  { %4181 = vst [vmem:[#allocation29_spill] sm:$0xff] %v3761_v0  ;;  %4182 = vst [vmem:[#allocation30_spill] sm:$0xff] %v3764_v57 }
 0x127   :  { %4183 = vst [vmem:[#allocation31_spill] sm:$0xff] %v3766_v62  ;;  %4184 = vst [vmem:[#allocation32_spill] sm:$0xff] %v3769_v60 }
 0x129   :  { %v222_v3 = vpop.f32.mrb[12].mxu0  ;;  %v295_v2 = vpop.f32.mrb[12].mxu1 }
 0x12a   :  { %v3771_v25 = vadd.f32 %v222_v3, %v88_v53  ;;  %v224_v48 = vpop.f32.mrb[13].mxu0  ;;  %v3774_v5 = vadd.f32 %v295_v2, %v3713_v49  ;;  %v297_v41 = vpop.f32.mrb[13].mxu1 }
 0x12b   :  { %v3776_v0 = vadd.f32 %v224_v48, %v92_v56  ;;  %v226_v43 = vpop.f32.mrb[14].mxu0  ;;  %v3779_v45 = vadd.f32 %v297_v41, %v3719_v52  ;;  %v299_v47 = vpop.f32.mrb[14].mxu1  ;;  %v193_v48 = vadd.f32 %v3715_v50, %v88_v53  ;;  %v266_v41 = vadd.f32 %v3717_v51, %v3713_v49 }
 0x12c   :  { %4185 = vst [vmem:[#allocation33_spill] sm:$0xff] %v3771_v25  ;;  %4186 = vst [vmem:[#allocation34_spill] sm:$0xff] %v3774_v5  ;;  %v3781_v62 = vadd.f32 %v226_v43, %v88_v53  ;;  %v228_v58 = vpop.f32.mrb[15].mxu0  ;;  %v3784_v60 = vadd.f32 %v299_v47, %v3713_v49  ;;  %v301_v3 = vpop.f32.mrb[15].mxu1  ;;  %v268_v43 = vadd.f32 %v267_v55, %v3719_v52 }
 0x12d   :  { %4187 = vst [vmem:[#allocation35_spill] sm:$0xff] %v3776_v0  ;;  %4188 = vst [vmem:[#allocation36_spill] sm:$0xff] %v3779_v45  ;;  %v3786_v25 = vadd.f32 %v228_v58, %v92_v56  ;;  %v3789_v2 = vadd.f32 %v301_v3, %v3719_v52  ;;  %v195_v0 = vadd.f32 %v194_v54, %v92_v56 }
 0x12e   :  { %4189 = vst [vmem:[#allocation37_spill] sm:$0xff] %v3781_v62  ;;  %4190 = vst [vmem:[#allocation38_spill] sm:$0xff] %v3784_v60 }
 0x12f   :  { %4191 = vst [vmem:[#allocation39_spill] sm:$0xff] %v3786_v25  ;;  %4192 = vst [vmem:[#allocation40_spill] sm:$0xff] %v3789_v2 }
 0x131   :  { %v567_v45 = vpop.f32.mrb[16].mxu0 }
 0x132   :  { %v615_v62 = vadd.f32 %v567_v45, %v193_v48  ;;  %v608_v5 = vpop.f32.mrb[16].mxu1  ;;  %v569_v57 = vpop.f32.mrb[17].mxu0  ;;  %v4193_v48 = vmov 0  }
 0x133   :  { %v617_v47 = vadd.f32 %v608_v5, %v266_v41  ;;  %v616_v60 = vadd.f32 %v569_v57, %v195_v0  ;;  %v610_v46 = vpop.f32.mrb[17].mxu1  ;;  %v571_v58 = vpop.f32.mrb[18].mxu0 }
 0x134   :  { %v619_v25 = vmul.f32 0.5, %v615_v62  ;;  %v618_v44 = vadd.f32 %v610_v46, %v268_v43  ;;  %v572_v3 = vpop.f32.mrb[19].mxu0  ;;  %v612_v2 = vpop.f32.mrb[18].mxu1 }
 0x135   :  { %v623_v42 = vmul.f32 0.5, %v616_v60  ;;  %v613_v50 = vpop.f32.mrb[19].mxu1 }
 0x136   :  { %3249 = vtanh.f32 %v619_v25  ;;  %v628_v49 = vmul.f32 0.5, %v618_v44 }
 0x137   :  { %3251 = vtanh.f32 %v623_v42 }
 0x138   :  { %3253 = vtanh.f32 %v617_v47 }
 0x139   :  { %3255 = vtanh.f32 %v628_v49 }
 0x140   :  { %v3250_v51 = vpop.eup %3249 }
 0x141   :  { %v3252_v53 = vpop.eup %3251  ;;  %v621_v52 = vmul.f32 0.5, %v3250_v51 }
 0x142   :  { %v625_v54 = vmul.f32 0.5, %v3252_v53  ;;  %v3254_v56 = vpop.eup %3253 }
 0x143   :  { %v622_v55 = vadd.f32 0.5, %v621_v52  ;;  %v3256_v46 = vpop.eup %3255 }
 0x144   :  { %v626_v0 = vadd.f32 0.5, %v625_v54  ;;  %v630_v60 = vmul.f32 0.5, %v3256_v46 }
 0x145   :  { %v634_v57 = vmul.f32 %v3254_v56, %v622_v55 }
 0x146   :  { %v633_v5 = vmul.f32 0.0, %v626_v0  ;;  %v631_v25 = vadd.f32 0.5, %v630_v60 }
 0x148   :  { %v3795_v62 = vadd.f32 %v634_v57, %v633_v5 }
 0x14a   :  { %3257 = vtanh.f32 %v3795_v62 }
 0x154   :  { %v3258_v42 = vpop.eup %3257 }
 0x155   :  { %v637_v45 = vmul.f32 %v3258_v42, %v631_v25 }
 0x157   :  { %v640_v44 = vpack.c.bf16 %v637_v45, %v637_v45  ;;  %642 = vst [vmem:[#allocation12] sm:$0xff] %v637_v45 }
 0x159   :  { %641 = vst [vmem:[#allocation4] sm:$0xf] %v640_v44 }
 0x160   :  { %v648_v2 = vld [vmem:[#allocation4] sm:$0xf] }
 0x161   :  { %874 = vmatmul.mubr.bf16.vlgmr.msra.gmra.mrb[20].mxu0 %v648_v2  ;;  %915 = vmatmul.mubr.bf16.vlgmr.msra.gmra.mrb[20].mxu1 %v648_v2 }
 0x162   :  { %1151 = vmatpush1.bf16.msra.mxu0 %v3562_v6  ;;  %1192 = vmatpush1.bf16.msra.mxu1 %v3566_v8 }
 0x163   :  { %1152 = vmatprep.subr.bf16.mxu0 %v3573_v10  ;;  %1193 = vmatprep.subr.bf16.mxu1 %v3579_v12 }
 0x164   :  { %1182 = vmatprep.mubr.bf16.mxu0 %v4193_v48  ;;  %1223 = vmatprep.mubr.bf16.mxu1 %v4193_v48 }
 0x166   :  { %1153 = vmatpush1.bf16.msra.mxu0 %v3577_v11  ;;  %1194 = vmatpush1.bf16.msra.mxu1 %v3583_v13 }
 0x167   :  { %1154 = vmatprep.subr.bf16.mxu0 %v3588_v15  ;;  %1195 = vmatprep.subr.bf16.mxu1 %v3593_v17 }
 0x16a   :  { %1155 = vmatpush1.bf16.msra.mxu0 %v3591_v16  ;;  %1196 = vmatpush1.bf16.msra.mxu1 %v3597_v18 }
 0x16b   :  { %1156 = vmatprep.subr.bf16.mxu0 %v3599_v19  ;;  %1197 = vmatprep.subr.bf16.mxu1 %v3604_v20 }
 0x16e   :  { %1157 = vmatpush1.bf16.msra.mxu0 %v3607_v21  ;;  %1198 = vmatpush1.bf16.msra.mxu1 %v3612_v22 }
 0x16f   :  { %1158 = vmatprep.subr.bf16.mxu0 %v3614_v23  ;;  %1199 = vmatprep.subr.bf16.mxu1 %v3618_v24 }
 0x172   :  { %1159 = vmatpush1.bf16.msra.mxu0 %v3621_v26  ;;  %1200 = vmatpush1.bf16.msra.mxu1 %v3625_v27 }
 0x173   :  { %1160 = vmatprep.subr.bf16.mxu0 %v3627_v28  ;;  %1201 = vmatprep.subr.bf16.mxu1 %v3630_v29 }
 0x176   :  { %1161 = vmatpush1.bf16.msra.mxu0 %v3634_v30  ;;  %1202 = vmatpush1.bf16.msra.mxu1 %v3637_v31 }
 0x177   :  { %1162 = vmatprep.subr.bf16.mxu0 %v3642_v32  ;;  %1203 = vmatprep.subr.bf16.mxu1 %v3646_v34 }
 0x17a   :  { %1163 = vmatpush1.bf16.msra.mxu0 %v3648_v35  ;;  %1204 = vmatpush1.bf16.msra.mxu1 %v3650_v36 }
 0x17b   :  { %1164 = vmatprep.subr.bf16.mxu0 %v3653_v37  ;;  %1205 = vmatprep.subr.bf16.mxu1 %v3655_v38 }
 0x17e   :  { %1165 = vmatpush1.bf16.msra.mxu0 %v3660_v39  ;;  %1206 = vmatpush1.bf16.msra.mxu1 %v3664_v40 }
 0x17f   :  { %1459 = vmatprep.subr.bf16.mxu0 %v3564_v7  ;;  %1500 = vmatprep.subr.bf16.mxu1 %v3569_v9 }
 0x234   :  { %v875_v41 = vpop.f32.mrb[20].mxu0  ;;  %v916_v43 = vpop.f32.mrb[20].mxu1 }
 0x235   :  { %v923_v47 = vadd.f32 %v875_v41, %v3721_v59  ;;  %v925_v58 = vadd.f32 %v916_v43, %v3724_v61  ;;  %v877_v3 = vpop.f32.mrb[21].mxu0  ;;  %v918_v50 = vpop.f32.mrb[21].mxu1 }
 0x236   :  { %v924_v49 = vadd.f32 %v877_v3, %v3726_v63  ;;  %v926_v51 = vadd.f32 %v918_v50, %v3729_v1  ;;  %v879_v53 = vpop.f32.mrb[22].mxu0  ;;  %v920_v52 = vpop.f32.mrb[22].mxu1  ;;  %v3886_v3 = vld [vmem:[#allocation11] ss:$16 sps:$4 sm:$0xff]   ;;  %v3888_v50 = vld [vmem:[#allocation11 + $0x8] ss:$16 sps:$4 sm:$0xff]  }
 0x237   :  { %v927_v54 = vmul.f32 0.5, %v923_v47  ;;  %v880_v55 = vpop.f32.mrb[23].mxu0  ;;  %v921_v56 = vpop.f32.mrb[23].mxu1  ;;  %v3898_v53 = vld [vmem:[#allocation11 + $0x20] ss:$16 sps:$4 sm:$0xff]  }
 0x238   :  { %v931_v7 = vmul.f32 0.5, %v924_v49  ;;  %v936_v9 = vmul.f32 0.5, %v926_v51  ;;  %v3894_v49 = vld [vmem:[#allocation11 + $0x24] ss:$16 sps:$4 sm:$0xff]   ;;  %v3896_v51 = vld [vmem:[#allocation11 + $0x2c] ss:$16 sps:$4 sm:$0xff]  }
 0x239   :  { %3259 = vtanh.f32 %v927_v54  ;;  %v3900_v52 = vld [vmem:[#allocation11 + $0x28] ss:$16 sps:$4 sm:$0xff]   ;;  %v3906_v54 = vld [vmem:[#allocation11 + $0x44] ss:$16 sps:$4 sm:$0xff]   ;;  %v3908_v55 = vld [vmem:[#allocation11 + $0x4c] ss:$16 sps:$4 sm:$0xff]  }
 0x23a   :  { %3261 = vtanh.f32 %v931_v7  ;;  %v3910_v56 = vld [vmem:[#allocation11 + $0x40] ss:$16 sps:$4 sm:$0xff]   ;;  %v3912_v7 = vld [vmem:[#allocation11 + $0x48] ss:$16 sps:$4 sm:$0xff]  }
 0x23b   :  { %3263 = vtanh.f32 %v925_v58  ;;  %v3884_v58 = vld [vmem:[#allocation11 + $0xc] ss:$16 sps:$4 sm:$0xff]  }
 0x23c   :  { %3265 = vtanh.f32 %v936_v9  ;;  %v3918_v9 = vld [vmem:[#allocation11 + $0x64] ss:$16 sps:$4 sm:$0xff]  }
 0x243   :  { %v3260_v0 = vpop.eup %3259 }
 0x244   :  { %v3262_v59 = vpop.eup %3261  ;;  %v929_v57 = vmul.f32 0.5, %v3260_v0  ;;  %v3920_v0 = vld [vmem:[#allocation11 + $0x6c] ss:$16 sps:$4 sm:$0xff]  }
 0x245   :  { %v933_v61 = vmul.f32 0.5, %v3262_v59  ;;  %v3264_v46 = vpop.eup %3263  ;;  %v3922_v59 = vld [vmem:[#allocation11 + $0x60] ss:$16 sps:$4 sm:$0xff]  }
 0x246   :  { %v930_v5 = vadd.f32 0.5, %v929_v57  ;;  %v3266_v42 = vpop.eup %3265  ;;  %v3924_v57 = vld [vmem:[#allocation11 + $0x68] ss:$16 sps:$4 sm:$0xff]  }
 0x247   :  { %v934_v63 = vadd.f32 0.5, %v933_v61  ;;  %v938_v45 = vmul.f32 0.5, %v3266_v42  ;;  %v3930_v61 = vld [vmem:[#allocation11 + $0x84] ss:$16 sps:$4 sm:$0xff]   ;;  %v3948_v42 = vld [vmem:[#allocation11 + $0xa8] ss:$16 sps:$4 sm:$0xff]  }
 0x248   :  { %v942_v60 = vmul.f32 %v3264_v46, %v930_v5  ;;  %v3932_v5 = vld [vmem:[#allocation11 + $0x8c] ss:$16 sps:$4 sm:$0xff]   ;;  %v3934_v46 = vld [vmem:[#allocation11 + $0x80] ss:$16 sps:$4 sm:$0xff]  }
 0x249   :  { %v941_v1 = vmul.f32 %v934_v63, %v3795_v62  ;;  %v939_v44 = vadd.f32 0.5, %v938_v45  ;;  %v3882_v62 = vld [vmem:[#allocation11 + $0x4] ss:$16 sps:$4 sm:$0xff]   ;;  %v3936_v63 = vld [vmem:[#allocation11 + $0x88] ss:$16 sps:$4 sm:$0xff]  }
 0x24a   :  { %v3954_v45 = vld [vmem:[#allocation11 + $0xc4] ss:$16 sps:$4 sm:$0xff]  }
 0x24b   :  { %v3837_v25 = vadd.f32 %v942_v60, %v941_v1  ;;  %v3942_v60 = vld [vmem:[#allocation11 + $0xa4] ss:$16 sps:$4 sm:$0xff]   ;;  %v3944_v1 = vld [vmem:[#allocation11 + $0xac] ss:$16 sps:$4 sm:$0xff]  }
 0x24d   :  { %3267 = vtanh.f32 %v3837_v25 }
 0x257   :  { %v3268_v2 = vpop.eup %3267 }
 0x258   :  { %v945_v41 = vmul.f32 %v3268_v2, %v939_v44  ;;  %v3956_v44 = vld [vmem:[#allocation11 + $0xcc] ss:$16 sps:$4 sm:$0xff]   ;;  %v3958_v2 = vld [vmem:[#allocation11 + $0xc0] ss:$16 sps:$4 sm:$0xff]  }
 0x25a   :  { %v948_v43 = vpack.c.bf16 %v945_v41, %v945_v41  ;;  %951 = vst [vmem:[#allocation12 + $0x8] sm:$0xff] %v945_v41  ;;  %v3960_v41 = vld [vmem:[#allocation11 + $0xc8] ss:$16 sps:$4 sm:$0xff]  }
 0x25c   :  { %949 = vst [vmem:[#allocation4] sm:$0xf] %v948_v43  ;;  %v3964_v43 = vld [vmem:[#allocation11 + $0xe4] ss:$16 sps:$4 sm:$0xff]  }
 0x263   :  { %v957_v47 = vld [vmem:[#allocation4] sm:$0xf] }
 0x264   :  { %1183 = vmatmul.mubr.bf16.vlgmr.msra.gmra.mrb[24].mxu0 %v957_v47  ;;  %1224 = vmatmul.mubr.bf16.vlgmr.msra.gmra.mrb[24].mxu1 %v957_v47  ;;  %v3966_v47 = vld [vmem:[#allocation11 + $0xec] ss:$16 sps:$4 sm:$0xff]  }
 0x265   :  { %1460 = vmatpush1.bf16.msra.mxu0 %v3562_v6  ;;  %1501 = vmatpush1.bf16.msra.mxu1 %v3566_v8 }
 0x266   :  { %1461 = vmatprep.subr.bf16.mxu0 %v3573_v10  ;;  %1502 = vmatprep.subr.bf16.mxu1 %v3579_v12 }
 0x267   :  { %1491 = vmatprep.mubr.bf16.mxu0 %v4193_v48  ;;  %1532 = vmatprep.mubr.bf16.mxu1 %v4193_v48 }
 0x269   :  { %1462 = vmatpush1.bf16.msra.mxu0 %v3577_v11  ;;  %1503 = vmatpush1.bf16.msra.mxu1 %v3583_v13 }
 0x26a   :  { %1463 = vmatprep.subr.bf16.mxu0 %v3588_v15  ;;  %1504 = vmatprep.subr.bf16.mxu1 %v3593_v17 }
 0x26d   :  { %1464 = vmatpush1.bf16.msra.mxu0 %v3591_v16  ;;  %1505 = vmatpush1.bf16.msra.mxu1 %v3597_v18  ;;  %v4194_v16 = vld [vmem:[#allocation20_spill] sm:$0xff] }
 0x26e   :  { %1465 = vmatprep.subr.bf16.mxu0 %v3599_v19  ;;  %1506 = vmatprep.subr.bf16.mxu1 %v3604_v20 }
 0x271   :  { %1466 = vmatpush1.bf16.msra.mxu0 %v3607_v21  ;;  %1507 = vmatpush1.bf16.msra.mxu1 %v3612_v22 }
 0x272   :  { %1467 = vmatprep.subr.bf16.mxu0 %v3614_v23  ;;  %1508 = vmatprep.subr.bf16.mxu1 %v3618_v24 }
 0x275   :  { %1468 = vmatpush1.bf16.msra.mxu0 %v3621_v26  ;;  %1509 = vmatpush1.bf16.msra.mxu1 %v3625_v27 }
 0x276   :  { %1469 = vmatprep.subr.bf16.mxu0 %v3627_v28  ;;  %1510 = vmatprep.subr.bf16.mxu1 %v3630_v29 }
 0x279   :  { %1470 = vmatpush1.bf16.msra.mxu0 %v3634_v30  ;;  %1511 = vmatpush1.bf16.msra.mxu1 %v3637_v31 }
 0x27a   :  { %1471 = vmatprep.subr.bf16.mxu0 %v3642_v32  ;;  %1512 = vmatprep.subr.bf16.mxu1 %v3646_v34 }
 0x27d   :  { %1472 = vmatpush1.bf16.msra.mxu0 %v3648_v35  ;;  %1513 = vmatpush1.bf16.msra.mxu1 %v3650_v36 }
 0x27e   :  { %1473 = vmatprep.subr.bf16.mxu0 %v3653_v37  ;;  %1514 = vmatprep.subr.bf16.mxu1 %v3655_v38 }
 0x281   :  { %1474 = vmatpush1.bf16.msra.mxu0 %v3660_v39  ;;  %1515 = vmatpush1.bf16.msra.mxu1 %v3664_v40 }
 0x282   :  { %1768 = vmatprep.subr.bf16.mxu0 %v3882_v62  ;;  %1809 = vmatprep.subr.bf16.mxu1 %v3884_v58 }
 0x337   :  { %v1184_v6 = vpop.f32.mrb[24].mxu0  ;;  %v1225_v8 = vpop.f32.mrb[24].mxu1 }
 0x338   :  { %v1232_v10 = vadd.f32 %v1184_v6, %v3731_v4  ;;  %v1234_v11 = vadd.f32 %v1225_v8, %v3734_v14  ;;  %v1186_v12 = vpop.f32.mrb[25].mxu0  ;;  %v1227_v13 = vpop.f32.mrb[25].mxu1  ;;  %v3970_v6 = vld [vmem:[#allocation11 + $0xe0] ss:$16 sps:$4 sm:$0xff]   ;;  %v3972_v8 = vld [vmem:[#allocation11 + $0xe8] ss:$16 sps:$4 sm:$0xff]  }
 0x339   :  { %v1233_v15 = vadd.f32 %v1186_v12, %v3736_v33  ;;  %v1235_v17 = vadd.f32 %v1227_v13, %v4194_v16  ;;  %v1188_v18 = vpop.f32.mrb[26].mxu0  ;;  %v1229_v19 = vpop.f32.mrb[26].mxu1  ;;  %v4195_v12 = vld [vmem:[#allocation21_spill] sm:$0xff] }
 0x33a   :  { %v1236_v20 = vmul.f32 0.5, %v1232_v10  ;;  %v1189_v21 = vpop.f32.mrb[27].mxu0  ;;  %v1230_v22 = vpop.f32.mrb[27].mxu1  ;;  %v4197_v19 = vld [vmem:[#allocation23_spill] sm:$0xff] }
 0x33b   :  { %v1240_v23 = vmul.f32 0.5, %v1233_v15  ;;  %v1245_v24 = vmul.f32 0.5, %v1235_v17  ;;  %v4196_v15 = vld [vmem:[#allocation22_spill] sm:$0xff]  ;;  %v4198_v21 = vld [vmem:[#allocation24_spill] sm:$0xff] }
 0x33c   :  { %3269 = vtanh.f32 %v1236_v20 }
 0x33d   :  { %3271 = vtanh.f32 %v1240_v23 }
 0x33e   :  { %3273 = vtanh.f32 %v1234_v11 }
 0x33f   :  { %3275 = vtanh.f32 %v1245_v24 }
 0x346   :  { %v3270_v26 = vpop.eup %3269 }
 0x347   :  { %v3272_v27 = vpop.eup %3271  ;;  %v1238_v28 = vmul.f32 0.5, %v3270_v26 }
 0x348   :  { %v1242_v29 = vmul.f32 0.5, %v3272_v27  ;;  %v3274_v31 = vpop.eup %3273 }
 0x349   :  { %v1239_v30 = vadd.f32 0.5, %v1238_v28  ;;  %v3276_v37 = vpop.eup %3275 }
 0x34a   :  { %v1243_v32 = vadd.f32 0.5, %v1242_v29  ;;  %v1247_v38 = vmul.f32 0.5, %v3276_v37 }
 0x34b   :  { %v1251_v34 = vmul.f32 %v3274_v31, %v1239_v30 }
 0x34c   :  { %v1250_v35 = vmul.f32 %v1243_v32, %v3837_v25  ;;  %v1248_v39 = vadd.f32 0.5, %v1247_v38  ;;  %v3946_v25 = vld [vmem:[#allocation11 + $0xa0] ss:$16 sps:$4 sm:$0xff]  }
 0x34e   :  { %v3877_v36 = vadd.f32 %v1251_v34, %v1250_v35 }
 0x350   :  { %3277 = vtanh.f32 %v3877_v36 }
 0x35a   :  { %v3278_v40 = vpop.eup %3277 }
 0x35b   :  { %v1254_v4 = vmul.f32 %v3278_v40, %v1248_v39 }
 0x35d   :  { %v1257_v14 = vpack.c.bf16 %v1254_v4, %v1254_v4  ;;  %1260 = vst [vmem:[#allocation12 + $0x10] sm:$0xff] %v1254_v4 }
 0x35f   :  { %1258 = vst [vmem:[#allocation4] sm:$0xf] %v1257_v14 }
 0x366   :  { %v1266_v33 = vld [vmem:[#allocation4] sm:$0xf] }
 0x367   :  { %1492 = vmatmul.mubr.bf16.vlgmr.msra.gmra.mrb[28].mxu0 %v1266_v33  ;;  %1533 = vmatmul.mubr.bf16.vlgmr.msra.gmra.mrb[28].mxu1 %v1266_v33 }
 0x368   :  { %1800 = vmatprep.mubr.bf16.mxu0 %v4193_v48  ;;  %1841 = vmatprep.mubr.bf16.mxu1 %v4193_v48 }
 0x369   :  { %1769 = vmatpush1.bf16.msra.mxu0 %v3886_v3  ;;  %1810 = vmatpush1.bf16.msra.mxu1 %v3888_v50 }
 0x36a   :  { %1770 = vmatprep.subr.bf16.mxu0 %v3894_v49  ;;  %1811 = vmatprep.subr.bf16.mxu1 %v3896_v51 }
 0x36d   :  { %1771 = vmatpush1.bf16.msra.mxu0 %v3898_v53  ;;  %1812 = vmatpush1.bf16.msra.mxu1 %v3900_v52 }
 0x36e   :  { %1772 = vmatprep.subr.bf16.mxu0 %v3906_v54  ;;  %1813 = vmatprep.subr.bf16.mxu1 %v3908_v55 }
 0x371   :  { %1773 = vmatpush1.bf16.msra.mxu0 %v3910_v56  ;;  %1814 = vmatpush1.bf16.msra.mxu1 %v3912_v7 }
 0x372   :  { %1774 = vmatprep.subr.bf16.mxu0 %v3918_v9  ;;  %1815 = vmatprep.subr.bf16.mxu1 %v3920_v0 }
 0x375   :  { %1775 = vmatpush1.bf16.msra.mxu0 %v3922_v59  ;;  %1816 = vmatpush1.bf16.msra.mxu1 %v3924_v57 }
 0x376   :  { %1776 = vmatprep.subr.bf16.mxu0 %v3930_v61  ;;  %1817 = vmatprep.subr.bf16.mxu1 %v3932_v5 }
 0x379   :  { %1777 = vmatpush1.bf16.msra.mxu0 %v3934_v46  ;;  %1818 = vmatpush1.bf16.msra.mxu1 %v3936_v63 }
 0x37a   :  { %1778 = vmatprep.subr.bf16.mxu0 %v3942_v60  ;;  %1819 = vmatprep.subr.bf16.mxu1 %v3944_v1 }
 0x37d   :  { %1779 = vmatpush1.bf16.msra.mxu0 %v3946_v25  ;;  %1820 = vmatpush1.bf16.msra.mxu1 %v3948_v42 }
 0x37e   :  { %1780 = vmatprep.subr.bf16.mxu0 %v3954_v45  ;;  %1821 = vmatprep.subr.bf16.mxu1 %v3956_v44 }
 0x381   :  { %1781 = vmatpush1.bf16.msra.mxu0 %v3958_v2  ;;  %1822 = vmatpush1.bf16.msra.mxu1 %v3960_v41 }
 0x382   :  { %1782 = vmatprep.subr.bf16.mxu0 %v3964_v43  ;;  %1823 = vmatprep.subr.bf16.mxu1 %v3966_v47 }
 0x385   :  { %1783 = vmatpush1.bf16.msra.mxu0 %v3970_v6  ;;  %1824 = vmatpush1.bf16.msra.mxu1 %v3972_v8 }
 0x386   :  { %2077 = vmatprep.subr.bf16.mxu0 %v3882_v62  ;;  %2118 = vmatprep.subr.bf16.mxu1 %v3884_v58 }
 0x43a   :  { %v1493_v10 = vpop.f32.mrb[28].mxu0  ;;  %v1534_v11 = vpop.f32.mrb[28].mxu1 }
 0x43b   :  { %v1541_v13 = vadd.f32 %v1493_v10, %v4195_v12  ;;  %v1543_v16 = vadd.f32 %v1534_v11, %v4196_v15  ;;  %v1495_v17 = vpop.f32.mrb[29].mxu0  ;;  %v1536_v18 = vpop.f32.mrb[29].mxu1 }
 0x43c   :  { %v1542_v20 = vadd.f32 %v1495_v17, %v4197_v19  ;;  %v1544_v22 = vadd.f32 %v1536_v18, %v4198_v21  ;;  %v1497_v23 = vpop.f32.mrb[30].mxu0  ;;  %v1538_v24 = vpop.f32.mrb[30].mxu1  ;;  %v4199_v18 = vld [vmem:[#allocation25_spill] sm:$0xff] }
 0x43d   :  { %v1545_v26 = vmul.f32 0.5, %v1541_v13  ;;  %v1498_v27 = vpop.f32.mrb[31].mxu0  ;;  %v1539_v28 = vpop.f32.mrb[31].mxu1  ;;  %v4201_v24 = vld [vmem:[#allocation27_spill] sm:$0xff] }
 0x43e   :  { %v1549_v29 = vmul.f32 0.5, %v1542_v20  ;;  %v1554_v30 = vmul.f32 0.5, %v1544_v22  ;;  %v4200_v20 = vld [vmem:[#allocation26_spill] sm:$0xff]  ;;  %v4202_v27 = vld [vmem:[#allocation28_spill] sm:$0xff] }
 0x43f   :  { %3279 = vtanh.f32 %v1545_v26 }
 0x440   :  { %3281 = vtanh.f32 %v1549_v29 }
 0x441   :  { %3283 = vtanh.f32 %v1543_v16 }
 0x442   :  { %3285 = vtanh.f32 %v1554_v30 }
 0x449   :  { %v3280_v31 = vpop.eup %3279 }
 0x44a   :  { %v3282_v32 = vpop.eup %3281  ;;  %v1547_v34 = vmul.f32 0.5, %v3280_v31 }
 0x44b   :  { %v1551_v35 = vmul.f32 0.5, %v3282_v32  ;;  %v3284_v38 = vpop.eup %3283 }
 0x44c   :  { %v1548_v37 = vadd.f32 0.5, %v1547_v34  ;;  %v3286_v33 = vpop.eup %3285 }
 0x44d   :  { %v1552_v39 = vadd.f32 0.5, %v1551_v35  ;;  %v1556_v10 = vmul.f32 0.5, %v3286_v33 }
 0x44e   :  { %v1560_v40 = vmul.f32 %v3284_v38, %v1548_v37 }
 0x44f   :  { %v1559_v4 = vmul.f32 %v1552_v39, %v3877_v36  ;;  %v1557_v11 = vadd.f32 0.5, %v1556_v10 }
 0x451   :  { %v3985_v14 = vadd.f32 %v1560_v40, %v1559_v4 }
 0x453   :  { %3287 = vtanh.f32 %v3985_v14 }
 0x45d   :  { %v3288_v12 = vpop.eup %3287 }
 0x45e   :  { %v1563_v13 = vmul.f32 %v3288_v12, %v1557_v11 }
 0x460   :  { %v1566_v15 = vpack.c.bf16 %v1563_v13, %v1563_v13  ;;  %1569 = vst [vmem:[#allocation12 + $0x18] sm:$0xff] %v1563_v13 }
 0x462   :  { %1567 = vst [vmem:[#allocation4] sm:$0xf] %v1566_v15 }
 0x469   :  { %v1575_v16 = vld [vmem:[#allocation4] sm:$0xf] }
 0x46a   :  { %1801 = vmatmul.mubr.bf16.vlgmr.msra.gmra.mrb[32].mxu0 %v1575_v16  ;;  %1842 = vmatmul.mubr.bf16.vlgmr.msra.gmra.mrb[32].mxu1 %v1575_v16 }
 0x46b   :  { %2078 = vmatpush1.bf16.msra.mxu0 %v3886_v3  ;;  %2119 = vmatpush1.bf16.msra.mxu1 %v3888_v50 }
 0x46c   :  { %2079 = vmatprep.subr.bf16.mxu0 %v3894_v49  ;;  %2120 = vmatprep.subr.bf16.mxu1 %v3896_v51 }
 0x46d   :  { %2109 = vmatprep.mubr.bf16.mxu0 %v4193_v48  ;;  %2150 = vmatprep.mubr.bf16.mxu1 %v4193_v48 }
 0x46f   :  { %2080 = vmatpush1.bf16.msra.mxu0 %v3898_v53  ;;  %2121 = vmatpush1.bf16.msra.mxu1 %v3900_v52 }
 0x470   :  { %2081 = vmatprep.subr.bf16.mxu0 %v3906_v54  ;;  %2122 = vmatprep.subr.bf16.mxu1 %v3908_v55 }
 0x473   :  { %2082 = vmatpush1.bf16.msra.mxu0 %v3910_v56  ;;  %2123 = vmatpush1.bf16.msra.mxu1 %v3912_v7 }
 0x474   :  { %2083 = vmatprep.subr.bf16.mxu0 %v3918_v9  ;;  %2124 = vmatprep.subr.bf16.mxu1 %v3920_v0 }
 0x477   :  { %2084 = vmatpush1.bf16.msra.mxu0 %v3922_v59  ;;  %2125 = vmatpush1.bf16.msra.mxu1 %v3924_v57 }
 0x478   :  { %2085 = vmatprep.subr.bf16.mxu0 %v3930_v61  ;;  %2126 = vmatprep.subr.bf16.mxu1 %v3932_v5 }
 0x47b   :  { %2086 = vmatpush1.bf16.msra.mxu0 %v3934_v46  ;;  %2127 = vmatpush1.bf16.msra.mxu1 %v3936_v63 }
 0x47c   :  { %2087 = vmatprep.subr.bf16.mxu0 %v3942_v60  ;;  %2128 = vmatprep.subr.bf16.mxu1 %v3944_v1 }
 0x47f   :  { %2088 = vmatpush1.bf16.msra.mxu0 %v3946_v25  ;;  %2129 = vmatpush1.bf16.msra.mxu1 %v3948_v42 }
 0x480   :  { %2089 = vmatprep.subr.bf16.mxu0 %v3954_v45  ;;  %2130 = vmatprep.subr.bf16.mxu1 %v3956_v44 }
 0x483   :  { %2090 = vmatpush1.bf16.msra.mxu0 %v3958_v2  ;;  %2131 = vmatpush1.bf16.msra.mxu1 %v3960_v41 }
 0x484   :  { %2091 = vmatprep.subr.bf16.mxu0 %v3964_v43  ;;  %2132 = vmatprep.subr.bf16.mxu1 %v3966_v47 }
 0x487   :  { %2092 = vmatpush1.bf16.msra.mxu0 %v3970_v6  ;;  %2133 = vmatpush1.bf16.msra.mxu1 %v3972_v8 }
 0x488   :  { %2386 = vmatprep.subr.bf16.mxu0 %v3882_v62  ;;  %2427 = vmatprep.subr.bf16.mxu1 %v3884_v58 }
 0x53d   :  { %v1802_v36 = vpop.f32.mrb[32].mxu0  ;;  %v1843_v17 = vpop.f32.mrb[32].mxu1 }
 0x53e   :  { %v1850_v19 = vadd.f32 %v1802_v36, %v4199_v18  ;;  %v1852_v21 = vadd.f32 %v1843_v17, %v4200_v20  ;;  %v1804_v22 = vpop.f32.mrb[33].mxu0  ;;  %v1845_v23 = vpop.f32.mrb[33].mxu1 }
 0x53f   :  { %v1851_v26 = vadd.f32 %v1804_v22, %v4201_v24  ;;  %v1853_v28 = vadd.f32 %v1845_v23, %v4202_v27  ;;  %v1806_v29 = vpop.f32.mrb[34].mxu0  ;;  %v1847_v30 = vpop.f32.mrb[34].mxu1  ;;  %v4203_v23 = vld [vmem:[#allocation29_spill] sm:$0xff] }
 0x540   :  { %v1854_v31 = vmul.f32 0.5, %v1850_v19  ;;  %v1807_v32 = vpop.f32.mrb[35].mxu0  ;;  %v1848_v34 = vpop.f32.mrb[35].mxu1  ;;  %v4205_v30 = vld [vmem:[#allocation31_spill] sm:$0xff] }
 0x541   :  { %v1858_v35 = vmul.f32 0.5, %v1851_v26  ;;  %v1863_v37 = vmul.f32 0.5, %v1853_v28  ;;  %v4204_v26 = vld [vmem:[#allocation30_spill] sm:$0xff]  ;;  %v4206_v32 = vld [vmem:[#allocation32_spill] sm:$0xff] }
 0x542   :  { %3289 = vtanh.f32 %v1854_v31 }
 0x543   :  { %3291 = vtanh.f32 %v1858_v35 }
 0x544   :  { %3293 = vtanh.f32 %v1852_v21 }
 0x545   :  { %3295 = vtanh.f32 %v1863_v37 }
 0x54c   :  { %v3290_v38 = vpop.eup %3289 }
 0x54d   :  { %v3292_v39 = vpop.eup %3291  ;;  %v1856_v40 = vmul.f32 0.5, %v3290_v38 }
 0x54e   :  { %v1860_v4 = vmul.f32 0.5, %v3292_v39  ;;  %v3294_v10 = vpop.eup %3293 }
 0x54f   :  { %v1857_v33 = vadd.f32 0.5, %v1856_v40  ;;  %v3296_v16 = vpop.eup %3295 }
 0x550   :  { %v1861_v11 = vadd.f32 0.5, %v1860_v4  ;;  %v1865_v36 = vmul.f32 0.5, %v3296_v16 }
 0x551   :  { %v1869_v12 = vmul.f32 %v3294_v10, %v1857_v33 }
 0x552   :  { %v1868_v13 = vmul.f32 %v1861_v11, %v3985_v14  ;;  %v1866_v17 = vadd.f32 0.5, %v1865_v36 }
 0x554   :  { %v4027_v15 = vadd.f32 %v1869_v12, %v1868_v13 }
 0x556   :  { %3297 = vtanh.f32 %v4027_v15 }
 0x560   :  { %v3298_v18 = vpop.eup %3297 }
 0x561   :  { %v1872_v19 = vmul.f32 %v3298_v18, %v1866_v17 }
 0x563   :  { %v1875_v20 = vpack.c.bf16 %v1872_v19, %v1872_v19  ;;  %1878 = vst [vmem:[#allocation12 + $0x20] sm:$0xff] %v1872_v19 }
 0x565   :  { %1876 = vst [vmem:[#allocation4] sm:$0xf] %v1875_v20 }
 0x56c   :  { %v1884_v21 = vld [vmem:[#allocation4] sm:$0xf] }
 0x56d   :  { %2110 = vmatmul.mubr.bf16.vlgmr.msra.gmra.mrb[36].mxu0 %v1884_v21  ;;  %2151 = vmatmul.mubr.bf16.vlgmr.msra.gmra.mrb[36].mxu1 %v1884_v21 }
 0x56e   :  { %2387 = vmatpush1.bf16.msra.mxu0 %v3886_v3  ;;  %2428 = vmatpush1.bf16.msra.mxu1 %v3888_v50 }
 0x56f   :  { %2388 = vmatprep.subr.bf16.mxu0 %v3894_v49  ;;  %2429 = vmatprep.subr.bf16.mxu1 %v3896_v51 }
 0x570   :  { %2418 = vmatprep.mubr.bf16.mxu0 %v4193_v48  ;;  %2459 = vmatprep.mubr.bf16.mxu1 %v4193_v48 }
 0x572   :  { %2389 = vmatpush1.bf16.msra.mxu0 %v3898_v53  ;;  %2430 = vmatpush1.bf16.msra.mxu1 %v3900_v52 }
 0x573   :  { %2390 = vmatprep.subr.bf16.mxu0 %v3906_v54  ;;  %2431 = vmatprep.subr.bf16.mxu1 %v3908_v55 }
 0x576   :  { %2391 = vmatpush1.bf16.msra.mxu0 %v3910_v56  ;;  %2432 = vmatpush1.bf16.msra.mxu1 %v3912_v7 }
 0x577   :  { %2392 = vmatprep.subr.bf16.mxu0 %v3918_v9  ;;  %2433 = vmatprep.subr.bf16.mxu1 %v3920_v0 }
 0x57a   :  { %2393 = vmatpush1.bf16.msra.mxu0 %v3922_v59  ;;  %2434 = vmatpush1.bf16.msra.mxu1 %v3924_v57 }
 0x57b   :  { %2394 = vmatprep.subr.bf16.mxu0 %v3930_v61  ;;  %2435 = vmatprep.subr.bf16.mxu1 %v3932_v5 }
 0x57e   :  { %2395 = vmatpush1.bf16.msra.mxu0 %v3934_v46  ;;  %2436 = vmatpush1.bf16.msra.mxu1 %v3936_v63 }
 0x57f   :  { %2396 = vmatprep.subr.bf16.mxu0 %v3942_v60  ;;  %2437 = vmatprep.subr.bf16.mxu1 %v3944_v1 }
 0x582   :  { %2397 = vmatpush1.bf16.msra.mxu0 %v3946_v25  ;;  %2438 = vmatpush1.bf16.msra.mxu1 %v3948_v42 }
 0x583   :  { %2398 = vmatprep.subr.bf16.mxu0 %v3954_v45  ;;  %2439 = vmatprep.subr.bf16.mxu1 %v3956_v44 }
 0x586   :  { %2399 = vmatpush1.bf16.msra.mxu0 %v3958_v2  ;;  %2440 = vmatpush1.bf16.msra.mxu1 %v3960_v41 }
 0x587   :  { %2400 = vmatprep.subr.bf16.mxu0 %v3964_v43  ;;  %2441 = vmatprep.subr.bf16.mxu1 %v3966_v47 }
 0x58a   :  { %2401 = vmatpush1.bf16.msra.mxu0 %v3970_v6  ;;  %2442 = vmatpush1.bf16.msra.mxu1 %v3972_v8 }
 0x58b   :  { %2695 = vmatprep.subr.bf16.mxu0 %v3882_v62  ;;  %2736 = vmatprep.subr.bf16.mxu1 %v3884_v58 }
 0x640   :  { %v2111_v14 = vpop.f32.mrb[36].mxu0  ;;  %v2152_v22 = vpop.f32.mrb[36].mxu1 }
 0x641   :  { %v2159_v24 = vadd.f32 %v2111_v14, %v4203_v23  ;;  %v2161_v27 = vadd.f32 %v2152_v22, %v4204_v26  ;;  %v2113_v28 = vpop.f32.mrb[37].mxu0  ;;  %v2154_v29 = vpop.f32.mrb[37].mxu1 }
 0x642   :  { %v2160_v31 = vadd.f32 %v2113_v28, %v4205_v30  ;;  %v2162_v34 = vadd.f32 %v2154_v29, %v4206_v32  ;;  %v2115_v35 = vpop.f32.mrb[38].mxu0  ;;  %v2156_v37 = vpop.f32.mrb[38].mxu1  ;;  %v4211_v32 = vld [vmem:[#allocation37_spill] sm:$0xff] }
 0x643   :  { %v2163_v38 = vmul.f32 0.5, %v2159_v24  ;;  %v2116_v39 = vpop.f32.mrb[39].mxu0  ;;  %v2157_v40 = vpop.f32.mrb[39].mxu1  ;;  %v4212_v35 = vld [vmem:[#allocation38_spill] sm:$0xff] }
 0x644   :  { %v2167_v62 = vmul.f32 0.5, %v2160_v31  ;;  %v2172_v58 = vmul.f32 0.5, %v2162_v34  ;;  %v4213_v40 = vld [vmem:[#allocation39_spill] sm:$0xff] }
 0x645   :  { %3299 = vtanh.f32 %v2163_v38 }
 0x646   :  { %3301 = vtanh.f32 %v2167_v62 }
 0x647   :  { %3303 = vtanh.f32 %v2161_v27 }
 0x648   :  { %3305 = vtanh.f32 %v2172_v58  ;;  %v4214_v58 = vld [vmem:[#allocation40_spill] sm:$0xff] }
 0x64f   :  { %v3300_v4 = vpop.eup %3299 }
 0x650   :  { %v3302_v33 = vpop.eup %3301  ;;  %v2165_v10 = vmul.f32 0.5, %v3300_v4 }
 0x651   :  { %v2169_v11 = vmul.f32 0.5, %v3302_v33  ;;  %v3304_v13 = vpop.eup %3303 }
 0x652   :  { %v2166_v12 = vadd.f32 0.5, %v2165_v10  ;;  %v3306_v19 = vpop.eup %3305 }
 0x653   :  { %v2170_v16 = vadd.f32 0.5, %v2169_v11  ;;  %v2174_v20 = vmul.f32 0.5, %v3306_v19 }
 0x654   :  { %v2178_v36 = vmul.f32 %v3304_v13, %v2166_v12 }
 0x655   :  { %v2177_v17 = vmul.f32 %v2170_v16, %v4027_v15  ;;  %v2175_v21 = vadd.f32 0.5, %v2174_v20 }
 0x657   :  { %v4069_v18 = vadd.f32 %v2178_v36, %v2177_v17 }
 0x659   :  { %3307 = vtanh.f32 %v4069_v18 }
 0x663   :  { %v3308_v14 = vpop.eup %3307 }
 0x664   :  { %v2181_v22 = vmul.f32 %v3308_v14, %v2175_v21 }
 0x666   :  { %v2184_v23 = vpack.c.bf16 %v2181_v22, %v2181_v22  ;;  %2187 = vst [vmem:[#allocation12 + $0x28] sm:$0xff] %v2181_v22 }
 0x668   :  { %2185 = vst [vmem:[#allocation4] sm:$0xf] %v2184_v23 }
 0x66f   :  { %v2193_v24 = vld [vmem:[#allocation4] sm:$0xf] }
 0x670   :  { %2419 = vmatmul.mubr.bf16.vlgmr.msra.gmra.mrb[40].mxu0 %v2193_v24  ;;  %2460 = vmatmul.mubr.bf16.vlgmr.msra.gmra.mrb[40].mxu1 %v2193_v24 }
 0x671   :  { %2696 = vmatpush1.bf16.msra.mxu0 %v3886_v3  ;;  %2737 = vmatpush1.bf16.msra.mxu1 %v3888_v50  ;;  %v4207_v50 = vld [vmem:[#allocation33_spill] sm:$0xff] }
 0x672   :  { %2697 = vmatprep.subr.bf16.mxu0 %v3894_v49  ;;  %2738 = vmatprep.subr.bf16.mxu1 %v3896_v51  ;;  %v4208_v51 = vld [vmem:[#allocation34_spill] sm:$0xff] }
 0x673   :  { %2727 = vmatprep.mubr.bf16.mxu0 %v4193_v48  ;;  %2768 = vmatprep.mubr.bf16.mxu1 %v4193_v48 }
 0x675   :  { %2698 = vmatpush1.bf16.msra.mxu0 %v3898_v53  ;;  %2739 = vmatpush1.bf16.msra.mxu1 %v3900_v52 }
 0x676   :  { %2699 = vmatprep.subr.bf16.mxu0 %v3906_v54  ;;  %2740 = vmatprep.subr.bf16.mxu1 %v3908_v55  ;;  %v4209_v55 = vld [vmem:[#allocation35_spill] sm:$0xff] }
 0x679   :  { %2700 = vmatpush1.bf16.msra.mxu0 %v3910_v56  ;;  %2741 = vmatpush1.bf16.msra.mxu1 %v3912_v7  ;;  %v4210_v7 = vld [vmem:[#allocation36_spill] sm:$0xff] }
 0x67a   :  { %2701 = vmatprep.subr.bf16.mxu0 %v3918_v9  ;;  %2742 = vmatprep.subr.bf16.mxu1 %v3920_v0 }
 0x67d   :  { %2702 = vmatpush1.bf16.msra.mxu0 %v3922_v59  ;;  %2743 = vmatpush1.bf16.msra.mxu1 %v3924_v57 }
 0x67e   :  { %2703 = vmatprep.subr.bf16.mxu0 %v3930_v61  ;;  %2744 = vmatprep.subr.bf16.mxu1 %v3932_v5 }
 0x681   :  { %2704 = vmatpush1.bf16.msra.mxu0 %v3934_v46  ;;  %2745 = vmatpush1.bf16.msra.mxu1 %v3936_v63 }
 0x682   :  { %2705 = vmatprep.subr.bf16.mxu0 %v3942_v60  ;;  %2746 = vmatprep.subr.bf16.mxu1 %v3944_v1 }
 0x685   :  { %2706 = vmatpush1.bf16.msra.mxu0 %v3946_v25  ;;  %2747 = vmatpush1.bf16.msra.mxu1 %v3948_v42 }
 0x686   :  { %2707 = vmatprep.subr.bf16.mxu0 %v3954_v45  ;;  %2748 = vmatprep.subr.bf16.mxu1 %v3956_v44 }
 0x689   :  { %2708 = vmatpush1.bf16.msra.mxu0 %v3958_v2  ;;  %2749 = vmatpush1.bf16.msra.mxu1 %v3960_v41 }
 0x68a   :  { %2709 = vmatprep.subr.bf16.mxu0 %v3964_v43  ;;  %2750 = vmatprep.subr.bf16.mxu1 %v3966_v47 }
 0x68d   :  { %2710 = vmatpush1.bf16.msra.mxu0 %v3970_v6  ;;  %2751 = vmatpush1.bf16.msra.mxu1 %v3972_v8 }
 0x743   :  { %v2420_v48 = vpop.f32.mrb[40].mxu0  ;;  %v2461_v3 = vpop.f32.mrb[40].mxu1 }
 0x744   :  { %v2468_v49 = vadd.f32 %v2420_v48, %v4207_v50  ;;  %v2470_v53 = vadd.f32 %v2461_v3, %v4208_v51  ;;  %v2422_v52 = vpop.f32.mrb[41].mxu0  ;;  %v2463_v54 = vpop.f32.mrb[41].mxu1 }
 0x745   :  { %v2469_v56 = vadd.f32 %v2422_v52, %v4209_v55  ;;  %v2471_v9 = vadd.f32 %v2463_v54, %v4210_v7  ;;  %v2424_v0 = vpop.f32.mrb[42].mxu0  ;;  %v2465_v59 = vpop.f32.mrb[42].mxu1 }
 0x746   :  { %v2472_v57 = vmul.f32 0.5, %v2468_v49  ;;  %v2425_v61 = vpop.f32.mrb[43].mxu0  ;;  %v2466_v5 = vpop.f32.mrb[43].mxu1 }
 0x747   :  { %v2476_v46 = vmul.f32 0.5, %v2469_v56  ;;  %v2481_v63 = vmul.f32 0.5, %v2471_v9 }
 0x748   :  { %3309 = vtanh.f32 %v2472_v57 }
 0x749   :  { %3311 = vtanh.f32 %v2476_v46 }
 0x74a   :  { %3313 = vtanh.f32 %v2470_v53 }
 0x74b   :  { %3315 = vtanh.f32 %v2481_v63 }
 0x752   :  { %v3310_v60 = vpop.eup %3309 }
 0x753   :  { %v3312_v1 = vpop.eup %3311  ;;  %v2474_v25 = vmul.f32 0.5, %v3310_v60 }
 0x754   :  { %v2478_v42 = vmul.f32 0.5, %v3312_v1  ;;  %v3314_v44 = vpop.eup %3313 }
 0x755   :  { %v2475_v45 = vadd.f32 0.5, %v2474_v25  ;;  %v3316_v6 = vpop.eup %3315 }
 0x756   :  { %v2479_v2 = vadd.f32 0.5, %v2478_v42  ;;  %v2483_v8 = vmul.f32 0.5, %v3316_v6 }
 0x757   :  { %v2487_v41 = vmul.f32 %v3314_v44, %v2475_v45 }
 0x758   :  { %v2486_v43 = vmul.f32 %v2479_v2, %v4069_v18  ;;  %v2484_v15 = vadd.f32 0.5, %v2483_v8 }
 0x75a   :  { %v2488_v47 = vadd.f32 %v2487_v41, %v2486_v43 }
 0x75c   :  { %3317 = vtanh.f32 %v2488_v47 }
 0x766   :  { %v3318_v26 = vpop.eup %3317 }
 0x767   :  { %v2490_v27 = vmul.f32 %v3318_v26, %v2484_v15 }
 0x769   :  { %v2493_v28 = vpack.c.bf16 %v2490_v27, %v2490_v27  ;;  %2496 = vst [vmem:[#allocation12 + $0x30] sm:$0xff] %v2490_v27 }
 0x76b   :  { %2494 = vst [vmem:[#allocation4] sm:$0xf] %v2493_v28 }
 0x772   :  { %v2502_v29 = vld [vmem:[#allocation4] sm:$0xf] }
 0x773   :  { %2728 = vmatmul.mubr.bf16.vlgmr.msra.gmra.mrb[44].mxu0 %v2502_v29  ;;  %2769 = vmatmul.mubr.bf16.vlgmr.msra.gmra.mrb[44].mxu1 %v2502_v29 }
 0x846   :  { %v2729_v30 = vpop.f32.mrb[44].mxu0  ;;  %v2770_v31 = vpop.f32.mrb[44].mxu1 }
 0x847   :  { %v2777_v34 = vadd.f32 %v2729_v30, %v4211_v32  ;;  %v2779_v37 = vadd.f32 %v2770_v31, %v4212_v35  ;;  %v2731_v38 = vpop.f32.mrb[45].mxu0  ;;  %v2772_v39 = vpop.f32.mrb[45].mxu1 }
 0x848   :  { %v2778_v62 = vadd.f32 %v2731_v38, %v4213_v40  ;;  %v2780_v4 = vadd.f32 %v2772_v39, %v4214_v58  ;;  %v2733_v33 = vpop.f32.mrb[46].mxu0  ;;  %v2774_v10 = vpop.f32.mrb[46].mxu1 }
 0x849   :  { %v2781_v11 = vmul.f32 0.5, %v2777_v34  ;;  %v2734_v12 = vpop.f32.mrb[47].mxu0  ;;  %v2775_v13 = vpop.f32.mrb[47].mxu1 }
 0x84a   :  { %v2785_v16 = vmul.f32 0.5, %v2778_v62  ;;  %v2790_v36 = vmul.f32 0.5, %v2780_v4 }
 0x84b   :  { %3319 = vtanh.f32 %v2781_v11 }
 0x84c   :  { %3321 = vtanh.f32 %v2785_v16 }
 0x84d   :  { %3323 = vtanh.f32 %v2779_v37 }
 0x84e   :  { %3325 = vtanh.f32 %v2790_v36 }
 0x855   :  { %v3320_v17 = vpop.eup %3319 }
 0x856   :  { %v3322_v18 = vpop.eup %3321  ;;  %v2783_v19 = vmul.f32 0.5, %v3320_v17 }
 0x857   :  { %v2787_v20 = vmul.f32 0.5, %v3322_v18  ;;  %v3324_v14 = vpop.eup %3323 }
 0x858   :  { %v2784_v21 = vadd.f32 0.5, %v2783_v19  ;;  %v3326_v3 = vpop.eup %3325 }
 0x859   :  { %v2788_v22 = vadd.f32 0.5, %v2787_v20  ;;  %v2792_v50 = vmul.f32 0.5, %v3326_v3 }
 0x85a   :  { %v2796_v23 = vmul.f32 %v3324_v14, %v2784_v21 }
 0x85b   :  { %v2795_v24 = vmul.f32 %v2788_v22, %v2488_v47  ;;  %v2793_v49 = vadd.f32 0.5, %v2792_v50 }
 0x85d   :  { %v2797_v48 = vadd.f32 %v2796_v23, %v2795_v24 }
 0x85f   :  { %3327 = vtanh.f32 %v2797_v48  ;;  %2812 = vst [vmem:[#allocation15] sm:$0xff] %v2797_v48 }
 0x869   :  { %v3328_v51 = vpop.eup %3327 }
 0x86a   :  { %v2799_v53 = vmul.f32 %v3328_v51, %v2793_v49 }
 0x86c   :  { %v2802_v52 = vpack.c.bf16 %v2799_v53, %v2799_v53  ;;  %2805 = vst [vmem:[#allocation12 + $0x38] sm:$0xff] %v2799_v53  ;;  %2810 = vst [vmem:[#allocation13] sm:$0xff] %v2799_v53 }
 0x86d   :  { %3406 = shalt.err (!%p3403_p0)
}
 0x86e   :  { %s3407_s20 = scalar_lea.hbm %s4168_s5, 128 }
 0x86f   :  { %p3408_p1 = scmp.ne.s32.totalorder %s4168_s5, %s3407_s20  ;;  %p3411_p2 = scmp.lt.u32.totalorder %s3407_s20, %s4168_s5 }
 0x871   :  { %p3413_p3 = pnand %p3411_p2, %p3408_p1 }
 0x873   :  { %3416 = shalt.err (!%p3413_p3)
}
 0x874   :  { %2834 = dma.vmem_to_hbm [thread:$0]  %s2832_s8, 128, %s4168_s5, [#allocation14]   ;;  %2803 = vst [vmem:[#allocation4] sm:$0xf] %v2802_v52 }
 0x875   :  { %s3417_s26 = scalar_lea.vmem %s4113_s14, 1024  ;;  %p3422_p5 = scmp.lt.s32.totalorder %s4113_s14, %s4113_s14 }
 0x876   :  { %p3418_p4 = scmp.ne.s32.totalorder %s4113_s14, %s3417_s26  ;;  %p3423_p6 = scmp.lt.s32.totalorder %s3417_s26, %s3417_s26 }
 0x878   :  { %p3424_p7 = por %p3423_p6, %p3422_p5 }
 0x87a   :  { %p3425_p8 = pnand %p3424_p7, %p3418_p4 }
 0x87c   :  { %3428 = shalt.err (!%p3425_p8)
}
 0x87d   :  { %s3429_s29 = scalar_lea.hbm %s4167_s4, 1024 }
 0x87e   :  { %p3430_p9 = scmp.ne.s32.totalorder %s4167_s4, %s3429_s29  ;;  %p3433_p10 = scmp.lt.u32.totalorder %s3429_s29, %s4167_s4 }
 0x880   :  { %p3435_p11 = pnand %p3433_p10, %p3430_p9 }
 0x882   :  { %3438 = shalt.err (!%p3435_p11)
}
 0x883   :  { %s3480_s5 = smov 128   ;;  %s3481_s0 = smov 8  }
 0x884   :  { %2824 = dma.vmem_to_hbm [thread:$0]  %s4113_s14, 1024, %s4167_s4, [#allocation8], %s3480_s5, %s3480_s5, %s3481_s0  }
 0x885   :  { %s3439_s7 = scalar_lea.vmem %s4115_s16, 128  ;;  %p3444_p13 = scmp.lt.s32.totalorder %s4115_s16, %s4115_s16 }
 0x886   :  { %p3440_p12 = scmp.ne.s32.totalorder %s4115_s16, %s3439_s7  ;;  %p3445_p0 = scmp.lt.s32.totalorder %s3439_s7, %s3439_s7 }
 0x888   :  { %p3446_p1 = por %p3445_p0, %p3444_p13 }
 0x88a   :  { %p3447_p2 = pnand %p3446_p1, %p3440_p12 }
 0x88c   :  { %3450 = shalt.err (!%p3447_p2)
}
 0x88d   :  { %s3451_s13 = scalar_lea.hbm %s4169_s6, 128 }
 0x88e   :  { %p3452_p3 = scmp.ne.s32.totalorder %s4169_s6, %s3451_s13  ;;  %p3455_p4 = scmp.lt.u32.totalorder %s3451_s13, %s4169_s6 }
 0x890   :  { %p3457_p5 = pnand %p3455_p4, %p3452_p3 }
 0x892   :  { %3460 = shalt.err (!%p3457_p5)
}
 0x893   :  { %2844 = dma.vmem_to_hbm [thread:$0]  %s4115_s16, 128, %s4169_s6, [#allocation14]  }
 0x894   :  { %3465 = dma.done.wait [#allocation8], 1024  }
 0x895   :  { %3466 = vsyncadd [#allocation8], 4294966272 }
 0x896   :  { %3467 = dma.done.wait [#allocation14], 256  }
 0x897   :  { %3468 = vsyncadd [#allocation14], 4294967040 }
 0x898   :  { %2854 = vsyncpa [#allocation7], 1 }
 0x899   :  { %2855 = vsyncpa [#allocation10], 1 }
 0x89a   :  { %2856 = vsyncpa [#allocation8], 1 }
 0x89b   :  { %2857 = vsyncpa [#allocation14], 1 }

</bundles_post_ra>
